<compile_context>
chip_gen: v7x
topology: tpu7x:2x2x1
jax: 0.10.0
libtpu: 0.0.40
codegen_flags: <defaults>
</compile_context>

<pallas_src>
import jax
import jax.numpy as jnp
from jax import lax
from jax.experimental import pallas as pl
from jax.experimental.pallas import tpu as pltpu


# bf16 recommended on v6e/v7x (and for MXU operands on v5e): ~2x MXU
# throughput and half the pad-scratch VMEM/stores; accumulation stays f32.
# Default f32 so the forward pass matches the f32 PyTorch module exactly.
MXU_DTYPE = jnp.float32


# --------------------------- per-generation sizing -------------------------- #

def _vmem_limit_bytes():
    """Scoped-VMEM limit ~= 3/4 of physical VMEM, capped at 100 MiB.

    ~96 MiB on v5e/v6e (128 MiB physical; v5e's default scoped limit is only
    16 MiB so an explicit raise matters), ~48 MiB on v7x (64 MiB physical).
    """
    cap = 64 * 1024 * 1024                      # safe fallback on every gen
    try:
        cap = int(pltpu.get_tpu_info().vmem_capacity_bytes)
    except Exception:
        pass
    if not cap or cap < 32 * 1024 * 1024:
        cap = 64 * 1024 * 1024
    return int(min(cap * 3 // 4, 100 * 1024 * 1024))


def _pick_block_n(N, Ho, Wo, Cin, Cmid, Cout, mxu_itemsize, budget_bytes):
    """Largest divisor of N (<=8) images per grid step that fits the budget.

    The estimate counts double-buffered input/output blocks, the two padded
    activation scratches, weights, and the compiler-managed temporaries
    (pooled, tap, y1/y2 accumulators) that live outside declared scratch.
    """
    def estimate(nb):
        m = nb * Ho * Wo
        io = 2 * nb * (Ho * 2 * Wo * 2 * Cin) * 4 + 2 * nb * Ho * Wo * Cout * 4
        pads = nb * (Ho + 2) * (Wo + 2) * (Cin + Cmid) * mxu_itemsize
        temps = m * (2 * Cin + max(Cin, Cmid) + 2 * Cmid + 2 * Cout) * 4
        weights = 2 * 9 * (Cin * Cmid + Cmid * Cout) * mxu_itemsize
        return io + pads + temps + weights

    for nb in range(min(N, 8), 0, -1):
        if N % nb == 0 and estimate(nb) <= budget_bytes:
            return nb
    return 1


# ----------------------- fused pool + double-conv kernel -------------------- #

def _make_down_kernel(Nb, Ho, Wo, Cin, Cmid, Cout, channel_major):
    M = Ho * Wo

    def kernel(x_ref, w1_ref, s1_ref, b1_ref, w2_ref, s2_ref, b2_ref, o_ref,
               pad1_ref, pad2_ref):
        # x_ref   : (Nb, Ho, 2, Wo, 2*Cin)  pooling windows pre-split (f32)
        # w*_ref  : (9, C, F)               per-tap conv weight slices
        # s*/b*   : (1, F)                  folded BN scale / bias (f32)
        # o_ref   : (Nb, Cout, Ho*Wo) or (Nb, Ho*Wo, Cout)
        # pad*_ref: (Nb, Ho+2, Wo+2, C)     zero-padded activations (VMEM)

        # ---- zero ONLY the 1-pixel border (interior overwritten below) ---- #
        def zero_border(pad_ref, C):
            zrow = jnp.zeros((Nb, 1, Wo + 2, C), pad_ref.dtype)
            zcol = jnp.zeros((Nb, Ho + 2, 1, C), pad_ref.dtype)
            pad_ref[:, 0:1, :, :] = zrow
            pad_ref[:, Ho + 1:Ho + 2, :, :] = zrow
            pad_ref[:, :, 0:1, :] = zcol
            pad_ref[:, :, Wo + 1:Wo + 2, :] = zcol

        zero_border(pad1_ref, Cin)
        zero_border(pad2_ref, Cmid)

        # ---------------- 2x2 max pool (VPU, f32) ---------------- #
        xv = x_ref[...]                                   # (Nb, Ho, 2, Wo, 2*Cin)
        hp = jnp.maximum(xv[:, :, 0], xv[:, :, 1])        # pool H -> (Nb, Ho, Wo, 2*Cin)
        pooled = jnp.maximum(hp[..., :Cin], hp[..., Cin:])  # pool W -> (Nb, Ho, Wo, Cin)
        pad1_ref[:, 1:Ho + 1, 1:Wo + 1, :] = pooled.astype(pad1_ref.dtype)

        # ----- conv3x3(pad=1) as 9 accumulating MXU matmuls + BN + ReLU ----- #
        def conv_bn_relu(pad_ref, w_ref, s_ref, b_ref, C):
            acc = None
            for k in range(9):                            # static unroll
                dy, dx = divmod(k, 3)
                parts = [pad_ref[n, dy:dy + Ho, dx:dx + Wo, :].reshape(M, C)
                         for n in range(Nb)]
                tap = parts[0] if Nb == 1 else jnp.concatenate(parts, axis=0)
                d = jnp.dot(tap, w_ref[k], preferred_element_type=jnp.float32)
                acc = d if acc is None else acc + d       # (Nb*M, F) f32
            # Folded (eval-mode) BatchNorm + ReLU epilogue in f32.
            return jnp.maximum(acc * s_ref[...] + b_ref[...], 0.0)

        y1 = conv_bn_relu(pad1_ref, w1_ref, s1_ref, b1_ref, Cin)
        for n in range(Nb):
            pad2_ref[n, 1:Ho + 1, 1:Wo + 1, :] = (
                y1[n * M:(n + 1) * M, :].reshape(Ho, Wo, Cmid)
                .astype(pad2_ref.dtype))

        y2 = conv_bn_relu(pad2_ref, w2_ref, s2_ref, b2_ref, Cmid)

        for n in range(Nb):
            yn = y2[n * M:(n + 1) * M, :]
            if channel_major:
                # Small Cout: channel-major store (spatial is the lane dim),
                # free reshape to NCHW outside.
                o_ref[n] = yn.T.astype(o_ref.dtype)
            else:
                # Cout >= 128: lane-dense store in C, no in-kernel transpose.
                o_ref[n] = yn.astype(o_ref.dtype)

    return kernel


def down_fused(x_nchw, w1, scale1, bias1, w2, scale2, bias2,
               *, mxu_dtype=MXU_DTYPE):
    N, Cin, H, W = x_nchw.shape
    # PyTorch MaxPool2d(2) floors: drop a trailing odd row/col if present.
    Hf, Wf = (H // 2) * 2, (W // 2) * 2
    if (Hf, Wf) != (H, W):
        x_nchw = x_nchw[:, :, :Hf, :Wf]
    Ho, Wo = Hf // 2, Wf // 2
    Cmid = w1.shape[-1]
    Cout = w2.shape[-1]

    # Tiny boundary transpose; a production pipeline stays NHWC end-to-end.
    # TODO(synk): cast the input to bf16 here on HBM-bound v5e shapes.
    x_nhwc = jnp.transpose(x_nchw, (0, 2, 3, 1))          # (N, Hf, Wf, Cin)
    # Free contiguous reshape exposing the 2x2 pooling windows to the kernel.
    x_pool = x_nhwc.reshape(N, Ho, 2, Wo, 2 * Cin)

    w1r = w1.reshape(9, Cin, Cmid).astype(mxu_dtype)      # per-tap weight slices
    w2r = w2.reshape(9, Cmid, Cout).astype(mxu_dtype)
    s1r = scale1.reshape(1, Cmid).astype(jnp.float32)
    b1r = bias1.reshape(1, Cmid).astype(jnp.float32)
    s2r = scale2.reshape(1, Cout).astype(jnp.float32)
    b2r = bias2.reshape(1, Cout).astype(jnp.float32)

    vmem_limit = _vmem_limit_bytes()
    mxu_itemsize = jnp.dtype(mxu_dtype).itemsize
    Nb = _pick_block_n(N, Ho, Wo, Cin, Cmid, Cout, mxu_itemsize,
                       budget_bytes=vmem_limit // 2)

    channel_major = Cout < 128
    out_shape = (N, Cout, Ho * Wo) if channel_major else (N, Ho * Wo, Cout)
    out_block = (Nb, Cout, Ho * Wo) if channel_major else (Nb, Ho * Wo, Cout)

    kernel = _make_down_kernel(Nb, Ho, Wo, Cin, Cmid, Cout, channel_major)

    out = pl.pallas_call(
        kernel,
        out_shape=jax.ShapeDtypeStruct(out_shape, x_nchw.dtype),
        grid=(N // Nb,),
        in_specs=[
            pl.BlockSpec((Nb, Ho, 2, Wo, 2 * Cin), lambda n: (n, 0, 0, 0, 0)),
            pl.BlockSpec((9, Cin, Cmid), lambda n: (0, 0, 0)),
            pl.BlockSpec((1, Cmid), lambda n: (0, 0)),
            pl.BlockSpec((1, Cmid), lambda n: (0, 0)),
            pl.BlockSpec((9, Cmid, Cout), lambda n: (0, 0, 0)),
            pl.BlockSpec((1, Cout), lambda n: (0, 0)),
            pl.BlockSpec((1, Cout), lambda n: (0, 0)),
        ],
        out_specs=pl.BlockSpec(out_block, lambda n: (n, 0, 0)),
        scratch_shapes=[
            pltpu.VMEM((Nb, Ho + 2, Wo + 2, Cin), mxu_dtype),   # padded pooled input
            pltpu.VMEM((Nb, Ho + 2, Wo + 2, Cmid), mxu_dtype),  # padded conv1 output
        ],
        compiler_params=pltpu.CompilerParams(
            dimension_semantics=("parallel",),                  # megacore over batch
            vmem_limit_bytes=vmem_limit,
        ),
    )(x_pool, w1r, s1r, b1r, w2r, s2r, b2r)

    if channel_major:
        return out.reshape(N, Cout, Ho, Wo)     # free contiguous reshape to NCHW
    return jnp.transpose(out.reshape(N, Ho, Wo, Cout), (0, 3, 1, 2))


# --------------------------- parameter creation ----------------------------- #

def init_down_params(key, in_channels, out_channels):
    mid_channels = out_channels
    ks = jax.random.split(key, 12)
    eps = 1e-5

    def make_block(kset, cin, cout):
        w = 0.1 * jax.random.normal(kset[0], (3, 3, cin, cout), jnp.float32)  # HWIO
        conv_b = 0.1 * jax.random.normal(kset[1], (cout,), jnp.float32)
        gamma = 1.0 + 0.1 * jax.random.normal(kset[2], (cout,), jnp.float32)
        beta = 0.1 * jax.random.normal(kset[3], (cout,), jnp.float32)
        rmean = 0.1 * jax.random.normal(kset[4], (cout,), jnp.float32)
        rvar = jax.random.uniform(kset[5], (cout,), jnp.float32, 0.5, 1.5)
        scale = gamma / jnp.sqrt(rvar + eps)
        bias = (conv_b - rmean) * scale + beta
        return w, scale, bias

    w1, s1, b1 = make_block(ks[0:6], in_channels, mid_channels)
    w2, s2, b2 = make_block(ks[6:12], mid_channels, out_channels)
    return dict(w1=w1, scale1=s1, bias1=b1, w2=w2, scale2=s2, bias2=b2)


# ------------------------------ Down forward -------------------------------- #

@jax.jit
def down_forward(x_nchw, w1, scale1, bias1, w2, scale2, bias2):
    return down_fused(x_nchw, w1, scale1, bias1, w2, scale2, bias2)


# ----------------------------- pure-JAX reference --------------------------- #

def down_reference(x_nchw, w1, scale1, bias1, w2, scale2, bias2):
    x = jnp.transpose(x_nchw, (0, 2, 3, 1))
    x = lax.reduce_window(x, -jnp.inf, lax.max,
                          (1, 2, 2, 1), (1, 2, 2, 1), "VALID")

    def cbr(x, w, s, b):
        y = lax.conv_general_dilated(
            x, w, window_strides=(1, 1), padding=[(1, 1), (1, 1)],
            dimension_numbers=("NHWC", "HWIO", "NHWC"))
        return jnp.maximum(y * s + b, 0.0)

    x = cbr(x, w1, scale1, bias1)
    x = cbr(x, w2, scale2, bias2)
    return jnp.transpose(x, (0, 3, 1, 2))


# ----------------------------------- main ----------------------------------- #

if __name__ == "__main__":
    key = jax.random.PRNGKey(0)
    k_x, k_p = jax.random.split(key)

    N, Cin, H, W = 2, 4, 16, 16
    Cout = 8
    x = jax.random.normal(k_x, (N, Cin, H, W), jnp.float32)    # NCHW like PyTorch

    p = init_down_params(k_p, Cin, Cout)

    out = down_forward(x, p["w1"], p["scale1"], p["bias1"],
                       p["w2"], p["scale2"], p["bias2"])
    out = jax.block_until_ready(out)

    ref = down_reference(x, p["w1"], p["scale1"], p["bias1"],
                         p["w2"], p["scale2"], p["bias2"])

    tol = 1e-4 if MXU_DTYPE == jnp.float32 else 3e-2   # bf16 MXU needs looser tol
    assert out.shape == (N, Cout, H // 2, W // 2), out.shape
    assert jnp.allclose(out, ref, atol=tol, rtol=tol), \
        float(jnp.max(jnp.abs(out - ref)))

    print("KERNEL_OK")
</pallas_src>

<mosaic_0001>
module attributes {stable_mosaic.version = 11 : i64} {
  func.func @kernel(%arg0: i32, %arg1: memref<2x8x2x8x8xf32, #tpu.memory_space<vmem>>, %arg2: memref<9x4x8xf32, #tpu.memory_space<vmem>>, %arg3: memref<1x8xf32, #tpu.memory_space<vmem>>, %arg4: memref<1x8xf32, #tpu.memory_space<vmem>>, %arg5: memref<9x8x8xf32, #tpu.memory_space<vmem>>, %arg6: memref<1x8xf32, #tpu.memory_space<vmem>>, %arg7: memref<1x8xf32, #tpu.memory_space<vmem>>, %arg8: memref<2x8x64xf32, #tpu.memory_space<vmem>>, %arg9: memref<2x10x10x4xf32, #tpu.memory_space<vmem>>, %arg10: memref<2x10x10x8xf32, #tpu.memory_space<vmem>>) attributes {dimension_semantics = [#tpu.dimension_semantics<parallel>], iteration_bounds = array<i64: 1>, scalar_prefetch = 0 : i64, scratch_operands = 2 : i64, tpu.core_type = #tpu.core_type<tc>, window_params = [{transform_indices = @transform_0, window_bounds = array<i64: 2, 8, 2, 8, 8>}, {pipeline_mode = #tpu.pipeline_mode<synchronous>, transform_indices = @transform_1, window_bounds = array<i64: 9, 4, 8>}, {pipeline_mode = #tpu.pipeline_mode<synchronous>, transform_indices = @transform_2, window_bounds = array<i64: 1, 8>}, {pipeline_mode = #tpu.pipeline_mode<synchronous>, transform_indices = @transform_3, window_bounds = array<i64: 1, 8>}, {pipeline_mode = #tpu.pipeline_mode<synchronous>, transform_indices = @transform_4, window_bounds = array<i64: 9, 8, 8>}, {pipeline_mode = #tpu.pipeline_mode<synchronous>, transform_indices = @transform_5, window_bounds = array<i64: 1, 8>}, {pipeline_mode = #tpu.pipeline_mode<synchronous>, transform_indices = @transform_6, window_bounds = array<i64: 1, 8>}, {transform_indices = @transform_7, window_bounds = array<i64: 2, 8, 64>}]} {
    %cst = arith.constant 0.000000e+00 : f32
    %0 = vector.broadcast %cst : f32 to vector<2x1x10x4xf32>
    %cst_0 = arith.constant 0.000000e+00 : f32
    %1 = vector.broadcast %cst_0 : f32 to vector<2x10x1x4xf32>
    %c0 = arith.constant 0 : index
    %c0_1 = arith.constant 0 : index
    %c0_2 = arith.constant 0 : index
    %c0_3 = arith.constant 0 : index
    %2 = vector.load %arg9[%c0, %c0_1, %c0_2, %c0_3] : memref<2x10x10x4xf32, #tpu.memory_space<vmem>>, vector<2x1x10x4xf32>
    tpu.vector_store %arg9[%c0, %c0_1, %c0_2, %c0_3], %0 {strides = array<i32>} : memref<2x10x10x4xf32, #tpu.memory_space<vmem>>, vector<2x1x10x4xf32>,
    %c0_4 = arith.constant 0 : index
    %c9 = arith.constant 9 : index
    %c0_5 = arith.constant 0 : index
    %c0_6 = arith.constant 0 : index
    %3 = vector.load %arg9[%c0_4, %c9, %c0_5, %c0_6] : memref<2x10x10x4xf32, #tpu.memory_space<vmem>>, vector<2x1x10x4xf32>
    tpu.vector_store %arg9[%c0_4, %c9, %c0_5, %c0_6], %0 {strides = array<i32>} : memref<2x10x10x4xf32, #tpu.memory_space<vmem>>, vector<2x1x10x4xf32>,
    %c0_7 = arith.constant 0 : index
    %c0_8 = arith.constant 0 : index
    %c0_9 = arith.constant 0 : index
    %c0_10 = arith.constant 0 : index
    %4 = vector.load %arg9[%c0_7, %c0_8, %c0_9, %c0_10] : memref<2x10x10x4xf32, #tpu.memory_space<vmem>>, vector<2x10x1x4xf32>
    tpu.vector_store %arg9[%c0_7, %c0_8, %c0_9, %c0_10], %1 {strides = array<i32>} : memref<2x10x10x4xf32, #tpu.memory_space<vmem>>, vector<2x10x1x4xf32>,
    %c0_11 = arith.constant 0 : index
    %c0_12 = arith.constant 0 : index
    %c9_13 = arith.constant 9 : index
    %c0_14 = arith.constant 0 : index
    %5 = vector.load %arg9[%c0_11, %c0_12, %c9_13, %c0_14] : memref<2x10x10x4xf32, #tpu.memory_space<vmem>>, vector<2x10x1x4xf32>
    tpu.vector_store %arg9[%c0_11, %c0_12, %c9_13, %c0_14], %1 {strides = array<i32>} : memref<2x10x10x4xf32, #tpu.memory_space<vmem>>, vector<2x10x1x4xf32>,
    %cst_15 = arith.constant 0.000000e+00 : f32
    %6 = vector.broadcast %cst_15 : f32 to vector<2x1x10x8xf32>
    %cst_16 = arith.constant 0.000000e+00 : f32
    %7 = vector.broadcast %cst_16 : f32 to vector<2x10x1x8xf32>
    %c0_17 = arith.constant 0 : index
    %c0_18 = arith.constant 0 : index
    %c0_19 = arith.constant 0 : index
    %c0_20 = arith.constant 0 : index
    %8 = vector.load %arg10[%c0_17, %c0_18, %c0_19, %c0_20] : memref<2x10x10x8xf32, #tpu.memory_space<vmem>>, vector<2x1x10x8xf32>
    tpu.vector_store %arg10[%c0_17, %c0_18, %c0_19, %c0_20], %6 {strides = array<i32>} : memref<2x10x10x8xf32, #tpu.memory_space<vmem>>, vector<2x1x10x8xf32>,
    %c0_21 = arith.constant 0 : index
    %c9_22 = arith.constant 9 : index
    %c0_23 = arith.constant 0 : index
    %c0_24 = arith.constant 0 : index
    %9 = vector.load %arg10[%c0_21, %c9_22, %c0_23, %c0_24] : memref<2x10x10x8xf32, #tpu.memory_space<vmem>>, vector<2x1x10x8xf32>
    tpu.vector_store %arg10[%c0_21, %c9_22, %c0_23, %c0_24], %6 {strides = array<i32>} : memref<2x10x10x8xf32, #tpu.memory_space<vmem>>, vector<2x1x10x8xf32>,
    %c0_25 = arith.constant 0 : index
    %c0_26 = arith.constant 0 : index
    %c0_27 = arith.constant 0 : index
    %c0_28 = arith.constant 0 : index
    %10 = vector.load %arg10[%c0_25, %c0_26, %c0_27, %c0_28] : memref<2x10x10x8xf32, #tpu.memory_space<vmem>>, vector<2x10x1x8xf32>
    tpu.vector_store %arg10[%c0_25, %c0_26, %c0_27, %c0_28], %7 {strides = array<i32>} : memref<2x10x10x8xf32, #tpu.memory_space<vmem>>, vector<2x10x1x8xf32>,
    %c0_29 = arith.constant 0 : index
    %c0_30 = arith.constant 0 : index
    %c9_31 = arith.constant 9 : index
    %c0_32 = arith.constant 0 : index
    %11 = vector.load %arg10[%c0_29, %c0_30, %c9_31, %c0_32] : memref<2x10x10x8xf32, #tpu.memory_space<vmem>>, vector<2x10x1x8xf32>
    tpu.vector_store %arg10[%c0_29, %c0_30, %c9_31, %c0_32], %7 {strides = array<i32>} : memref<2x10x10x8xf32, #tpu.memory_space<vmem>>, vector<2x10x1x8xf32>,
    %c0_33 = arith.constant 0 : index
    %c0_34 = arith.constant 0 : index
    %c0_35 = arith.constant 0 : index
    %c0_36 = arith.constant 0 : index
    %c0_37 = arith.constant 0 : index
    %12 = vector.load %arg1[%c0_33, %c0_34, %c0_35, %c0_36, %c0_37] : memref<2x8x2x8x8xf32, #tpu.memory_space<vmem>>, vector<2x8x2x8x8xf32>
    %13 = vector.extract_strided_slice %12 {offsets = [0, 0, 0, 0, 0], sizes = [2, 8, 1, 8, 8], strides = [1, 1, 1, 1, 1]} : vector<2x8x2x8x8xf32> to vector<2x8x1x8x8xf32>
    %14 = vector.shape_cast %13 : vector<2x8x1x8x8xf32> to vector<2x8x8x8xf32>
    %15 = vector.extract_strided_slice %12 {offsets = [0, 0, 1, 0, 0], sizes = [2, 8, 1, 8, 8], strides = [1, 1, 1, 1, 1]} : vector<2x8x2x8x8xf32> to vector<2x8x1x8x8xf32>
    %16 = vector.shape_cast %15 : vector<2x8x1x8x8xf32> to vector<2x8x8x8xf32>
    %17 = arith.maximumf %14, %16 : vector<2x8x8x8xf32>
    %18 = vector.extract_strided_slice %17 {offsets = [0, 0, 0, 0], sizes = [2, 8, 8, 4], strides = [1, 1, 1, 1]} : vector<2x8x8x8xf32> to vector<2x8x8x4xf32>
    %19 = vector.extract_strided_slice %17 {offsets = [0, 0, 0, 4], sizes = [2, 8, 8, 4], strides = [1, 1, 1, 1]} : vector<2x8x8x8xf32> to vector<2x8x8x4xf32>
    %20 = arith.maximumf %18, %19 : vector<2x8x8x4xf32>
    %c0_38 = arith.constant 0 : index
    %c1 = arith.constant 1 : index
    %c1_39 = arith.constant 1 : index
    %c0_40 = arith.constant 0 : index
    %21 = vector.load %arg9[%c0_38, %c1, %c1_39, %c0_40] : memref<2x10x10x4xf32, #tpu.memory_space<vmem>>, vector<2x8x8x4xf32>
    tpu.vector_store %arg9[%c0_38, %c1, %c1_39, %c0_40], %20 {strides = array<i32>} : memref<2x10x10x4xf32, #tpu.memory_space<vmem>>, vector<2x8x8x4xf32>,
    %c0_41 = arith.constant 0 : index
    %c0_42 = arith.constant 0 : index
    %c0_43 = arith.constant 0 : index
    %c0_44 = arith.constant 0 : index
    %22 = vector.load %arg9[%c0_41, %c0_42, %c0_43, %c0_44] : memref<2x10x10x4xf32, #tpu.memory_space<vmem>>, vector<1x8x8x4xf32>
    %23 = vector.shape_cast %22 : vector<1x8x8x4xf32> to vector<8x8x4xf32>
    %24 = vector.shape_cast %23 : vector<8x8x4xf32> to vector<64x4xf32>
    %c1_45 = arith.constant 1 : index
    %c0_46 = arith.constant 0 : index
    %c0_47 = arith.constant 0 : index
    %c0_48 = arith.constant 0 : index
    %25 = vector.load %arg9[%c1_45, %c0_46, %c0_47, %c0_48] : memref<2x10x10x4xf32, #tpu.memory_space<vmem>>, vector<1x8x8x4xf32>
    %26 = vector.shape_cast %25 : vector<1x8x8x4xf32> to vector<8x8x4xf32>
    %27 = vector.shape_cast %26 : vector<8x8x4xf32> to vector<64x4xf32>
    %28 = tpu.concatenate %24, %27 in 0 : vector<64x4xf32>, vector<64x4xf32> -> vector<128x4xf32>
    %c0_49 = arith.constant 0 : index
    %c0_50 = arith.constant 0 : index
    %c0_51 = arith.constant 0 : index
    %29 = vector.load %arg2[%c0_49, %c0_50, %c0_51] : memref<9x4x8xf32, #tpu.memory_space<vmem>>, vector<1x4x8xf32>
    %30 = vector.shape_cast %29 : vector<1x4x8xf32> to vector<4x8xf32>
    %cst_52 = arith.constant dense<0.000000e+00> : vector<128x8xf32>
    %31 = tpu.matmul %28, %30, %cst_52 {dimension_numbers = #tpu.dot_dimension_numbers<[1], [0], [0], [1], [0, 0, 1, 1], [], []>} : vector<128x4xf32>, vector<4x8xf32>, vector<128x8xf32> -> vector<128x8xf32>
    %c0_53 = arith.constant 0 : index
    %c0_54 = arith.constant 0 : index
    %c1_55 = arith.constant 1 : index
    %c0_56 = arith.constant 0 : index
    %32 = vector.load %arg9[%c0_53, %c0_54, %c1_55, %c0_56] : memref<2x10x10x4xf32, #tpu.memory_space<vmem>>, vector<1x8x8x4xf32>
    %33 = vector.shape_cast %32 : vector<1x8x8x4xf32> to vector<8x8x4xf32>
    %34 = vector.shape_cast %33 : vector<8x8x4xf32> to vector<64x4xf32>
    %c1_57 = arith.constant 1 : index
    %c0_58 = arith.constant 0 : index
    %c1_59 = arith.constant 1 : index
    %c0_60 = arith.constant 0 : index
    %35 = vector.load %arg9[%c1_57, %c0_58, %c1_59, %c0_60] : memref<2x10x10x4xf32, #tpu.memory_space<vmem>>, vector<1x8x8x4xf32>
    %36 = vector.shape_cast %35 : vector<1x8x8x4xf32> to vector<8x8x4xf32>
    %37 = vector.shape_cast %36 : vector<8x8x4xf32> to vector<64x4xf32>
    %38 = tpu.concatenate %34, %37 in 0 : vector<64x4xf32>, vector<64x4xf32> -> vector<128x4xf32>
    %c1_61 = arith.constant 1 : index
    %c0_62 = arith.constant 0 : index
    %c0_63 = arith.constant 0 : index
    %39 = vector.load %arg2[%c1_61, %c0_62, %c0_63] : memref<9x4x8xf32, #tpu.memory_space<vmem>>, vector<1x4x8xf32>
    %40 = vector.shape_cast %39 : vector<1x4x8xf32> to vector<4x8xf32>
    %cst_64 = arith.constant dense<0.000000e+00> : vector<128x8xf32>
    %41 = tpu.matmul %38, %40, %cst_64 {dimension_numbers = #tpu.dot_dimension_numbers<[1], [0], [0], [1], [0, 0, 1, 1], [], []>} : vector<128x4xf32>, vector<4x8xf32>, vector<128x8xf32> -> vector<128x8xf32>
    %42 = arith.addf %31, %41 : vector<128x8xf32>
    %c0_65 = arith.constant 0 : index
    %c0_66 = arith.constant 0 : index
    %c2 = arith.constant 2 : index
    %c0_67 = arith.constant 0 : index
    %43 = vector.load %arg9[%c0_65, %c0_66, %c2, %c0_67] : memref<2x10x10x4xf32, #tpu.memory_space<vmem>>, vector<1x8x8x4xf32>
    %44 = vector.shape_cast %43 : vector<1x8x8x4xf32> to vector<8x8x4xf32>
    %45 = vector.shape_cast %44 : vector<8x8x4xf32> to vector<64x4xf32>
    %c1_68 = arith.constant 1 : index
    %c0_69 = arith.constant 0 : index
    %c2_70 = arith.constant 2 : index
    %c0_71 = arith.constant 0 : index
    %46 = vector.load %arg9[%c1_68, %c0_69, %c2_70, %c0_71] : memref<2x10x10x4xf32, #tpu.memory_space<vmem>>, vector<1x8x8x4xf32>
    %47 = vector.shape_cast %46 : vector<1x8x8x4xf32> to vector<8x8x4xf32>
    %48 = vector.shape_cast %47 : vector<8x8x4xf32> to vector<64x4xf32>
    %49 = tpu.concatenate %45, %48 in 0 : vector<64x4xf32>, vector<64x4xf32> -> vector<128x4xf32>
    %c2_72 = arith.constant 2 : index
    %c0_73 = arith.constant 0 : index
    %c0_74 = arith.constant 0 : index
    %50 = vector.load %arg2[%c2_72, %c0_73, %c0_74] : memref<9x4x8xf32, #tpu.memory_space<vmem>>, vector<1x4x8xf32>
    %51 = vector.shape_cast %50 : vector<1x4x8xf32> to vector<4x8xf32>
    %cst_75 = arith.constant dense<0.000000e+00> : vector<128x8xf32>
    %52 = tpu.matmul %49, %51, %cst_75 {dimension_numbers = #tpu.dot_dimension_numbers<[1], [0], [0], [1], [0, 0, 1, 1], [], []>} : vector<128x4xf32>, vector<4x8xf32>, vector<128x8xf32> -> vector<128x8xf32>
    %53 = arith.addf %42, %52 : vector<128x8xf32>
    %c0_76 = arith.constant 0 : index
    %c1_77 = arith.constant 1 : index
    %c0_78 = arith.constant 0 : index
    %c0_79 = arith.constant 0 : index
    %54 = vector.load %arg9[%c0_76, %c1_77, %c0_78, %c0_79] : memref<2x10x10x4xf32, #tpu.memory_space<vmem>>, vector<1x8x8x4xf32>
    %55 = vector.shape_cast %54 : vector<1x8x8x4xf32> to vector<8x8x4xf32>
    %56 = vector.shape_cast %55 : vector<8x8x4xf32> to vector<64x4xf32>
    %c1_80 = arith.constant 1 : index
    %c1_81 = arith.constant 1 : index
    %c0_82 = arith.constant 0 : index
    %c0_83 = arith.constant 0 : index
    %57 = vector.load %arg9[%c1_80, %c1_81, %c0_82, %c0_83] : memref<2x10x10x4xf32, #tpu.memory_space<vmem>>, vector<1x8x8x4xf32>
    %58 = vector.shape_cast %57 : vector<1x8x8x4xf32> to vector<8x8x4xf32>
    %59 = vector.shape_cast %58 : vector<8x8x4xf32> to vector<64x4xf32>
    %60 = tpu.concatenate %56, %59 in 0 : vector<64x4xf32>, vector<64x4xf32> -> vector<128x4xf32>
    %c3 = arith.constant 3 : index
    %c0_84 = arith.constant 0 : index
    %c0_85 = arith.constant 0 : index
    %61 = vector.load %arg2[%c3, %c0_84, %c0_85] : memref<9x4x8xf32, #tpu.memory_space<vmem>>, vector<1x4x8xf32>
    %62 = vector.shape_cast %61 : vector<1x4x8xf32> to vector<4x8xf32>
    %cst_86 = arith.constant dense<0.000000e+00> : vector<128x8xf32>
    %63 = tpu.matmul %60, %62, %cst_86 {dimension_numbers = #tpu.dot_dimension_numbers<[1], [0], [0], [1], [0, 0, 1, 1], [], []>} : vector<128x4xf32>, vector<4x8xf32>, vector<128x8xf32> -> vector<128x8xf32>
    %64 = arith.addf %53, %63 : vector<128x8xf32>
    %c0_87 = arith.constant 0 : index
    %c1_88 = arith.constant 1 : index
    %c1_89 = arith.constant 1 : index
    %c0_90 = arith.constant 0 : index
    %65 = vector.load %arg9[%c0_87, %c1_88, %c1_89, %c0_90] : memref<2x10x10x4xf32, #tpu.memory_space<vmem>>, vector<1x8x8x4xf32>
    %66 = vector.shape_cast %65 : vector<1x8x8x4xf32> to vector<8x8x4xf32>
    %67 = vector.shape_cast %66 : vector<8x8x4xf32> to vector<64x4xf32>
    %c1_91 = arith.constant 1 : index
    %c1_92 = arith.constant 1 : index
    %c1_93 = arith.constant 1 : index
    %c0_94 = arith.constant 0 : index
    %68 = vector.load %arg9[%c1_91, %c1_92, %c1_93, %c0_94] : memref<2x10x10x4xf32, #tpu.memory_space<vmem>>, vector<1x8x8x4xf32>
    %69 = vector.shape_cast %68 : vector<1x8x8x4xf32> to vector<8x8x4xf32>
    %70 = vector.shape_cast %69 : vector<8x8x4xf32> to vector<64x4xf32>
    %71 = tpu.concatenate %67, %70 in 0 : vector<64x4xf32>, vector<64x4xf32> -> vector<128x4xf32>
    %c4 = arith.constant 4 : index
    %c0_95 = arith.constant 0 : index
    %c0_96 = arith.constant 0 : index
    %72 = vector.load %arg2[%c4, %c0_95, %c0_96] : memref<9x4x8xf32, #tpu.memory_space<vmem>>, vector<1x4x8xf32>
    %73 = vector.shape_cast %72 : vector<1x4x8xf32> to vector<4x8xf32>
    %cst_97 = arith.constant dense<0.000000e+00> : vector<128x8xf32>
    %74 = tpu.matmul %71, %73, %cst_97 {dimension_numbers = #tpu.dot_dimension_numbers<[1], [0], [0], [1], [0, 0, 1, 1], [], []>} : vector<128x4xf32>, vector<4x8xf32>, vector<128x8xf32> -> vector<128x8xf32>
    %75 = arith.addf %64, %74 : vector<128x8xf32>
    %c0_98 = arith.constant 0 : index
    %c1_99 = arith.constant 1 : index
    %c2_100 = arith.constant 2 : index
    %c0_101 = arith.constant 0 : index
    %76 = vector.load %arg9[%c0_98, %c1_99, %c2_100, %c0_101] : memref<2x10x10x4xf32, #tpu.memory_space<vmem>>, vector<1x8x8x4xf32>
    %77 = vector.shape_cast %76 : vector<1x8x8x4xf32> to vector<8x8x4xf32>
    %78 = vector.shape_cast %77 : vector<8x8x4xf32> to vector<64x4xf32>
    %c1_102 = arith.constant 1 : index
    %c1_103 = arith.constant 1 : index
    %c2_104 = arith.constant 2 : index
    %c0_105 = arith.constant 0 : index
    %79 = vector.load %arg9[%c1_102, %c1_103, %c2_104, %c0_105] : memref<2x10x10x4xf32, #tpu.memory_space<vmem>>, vector<1x8x8x4xf32>
    %80 = vector.shape_cast %79 : vector<1x8x8x4xf32> to vector<8x8x4xf32>
    %81 = vector.shape_cast %80 : vector<8x8x4xf32> to vector<64x4xf32>
    %82 = tpu.concatenate %78, %81 in 0 : vector<64x4xf32>, vector<64x4xf32> -> vector<128x4xf32>
    %c5 = arith.constant 5 : index
    %c0_106 = arith.constant 0 : index
    %c0_107 = arith.constant 0 : index
    %83 = vector.load %arg2[%c5, %c0_106, %c0_107] : memref<9x4x8xf32, #tpu.memory_space<vmem>>, vector<1x4x8xf32>
    %84 = vector.shape_cast %83 : vector<1x4x8xf32> to vector<4x8xf32>
    %cst_108 = arith.constant dense<0.000000e+00> : vector<128x8xf32>
    %85 = tpu.matmul %82, %84, %cst_108 {dimension_numbers = #tpu.dot_dimension_numbers<[1], [0], [0], [1], [0, 0, 1, 1], [], []>} : vector<128x4xf32>, vector<4x8xf32>, vector<128x8xf32> -> vector<128x8xf32>
    %86 = arith.addf %75, %85 : vector<128x8xf32>
    %c0_109 = arith.constant 0 : index
    %c2_110 = arith.constant 2 : index
    %c0_111 = arith.constant 0 : index
    %c0_112 = arith.constant 0 : index
    %87 = vector.load %arg9[%c0_109, %c2_110, %c0_111, %c0_112] : memref<2x10x10x4xf32, #tpu.memory_space<vmem>>, vector<1x8x8x4xf32>
    %88 = vector.shape_cast %87 : vector<1x8x8x4xf32> to vector<8x8x4xf32>
    %89 = vector.shape_cast %88 : vector<8x8x4xf32> to vector<64x4xf32>
    %c1_113 = arith.constant 1 : index
    %c2_114 = arith.constant 2 : index
    %c0_115 = arith.constant 0 : index
    %c0_116 = arith.constant 0 : index
    %90 = vector.load %arg9[%c1_113, %c2_114, %c0_115, %c0_116] : memref<2x10x10x4xf32, #tpu.memory_space<vmem>>, vector<1x8x8x4xf32>
    %91 = vector.shape_cast %90 : vector<1x8x8x4xf32> to vector<8x8x4xf32>
    %92 = vector.shape_cast %91 : vector<8x8x4xf32> to vector<64x4xf32>
    %93 = tpu.concatenate %89, %92 in 0 : vector<64x4xf32>, vector<64x4xf32> -> vector<128x4xf32>
    %c6 = arith.constant 6 : index
    %c0_117 = arith.constant 0 : index
    %c0_118 = arith.constant 0 : index
    %94 = vector.load %arg2[%c6, %c0_117, %c0_118] : memref<9x4x8xf32, #tpu.memory_space<vmem>>, vector<1x4x8xf32>
    %95 = vector.shape_cast %94 : vector<1x4x8xf32> to vector<4x8xf32>
    %cst_119 = arith.constant dense<0.000000e+00> : vector<128x8xf32>
    %96 = tpu.matmul %93, %95, %cst_119 {dimension_numbers = #tpu.dot_dimension_numbers<[1], [0], [0], [1], [0, 0, 1, 1], [], []>} : vector<128x4xf32>, vector<4x8xf32>, vector<128x8xf32> -> vector<128x8xf32>
    %97 = arith.addf %86, %96 : vector<128x8xf32>
    %c0_120 = arith.constant 0 : index
    %c2_121 = arith.constant 2 : index
    %c1_122 = arith.constant 1 : index
    %c0_123 = arith.constant 0 : index
    %98 = vector.load %arg9[%c0_120, %c2_121, %c1_122, %c0_123] : memref<2x10x10x4xf32, #tpu.memory_space<vmem>>, vector<1x8x8x4xf32>
    %99 = vector.shape_cast %98 : vector<1x8x8x4xf32> to vector<8x8x4xf32>
    %100 = vector.shape_cast %99 : vector<8x8x4xf32> to vector<64x4xf32>
    %c1_124 = arith.constant 1 : index
    %c2_125 = arith.constant 2 : index
    %c1_126 = arith.constant 1 : index
    %c0_127 = arith.constant 0 : index
    %101 = vector.load %arg9[%c1_124, %c2_125, %c1_126, %c0_127] : memref<2x10x10x4xf32, #tpu.memory_space<vmem>>, vector<1x8x8x4xf32>
    %102 = vector.shape_cast %101 : vector<1x8x8x4xf32> to vector<8x8x4xf32>
    %103 = vector.shape_cast %102 : vector<8x8x4xf32> to vector<64x4xf32>
    %104 = tpu.concatenate %100, %103 in 0 : vector<64x4xf32>, vector<64x4xf32> -> vector<128x4xf32>
    %c7 = arith.constant 7 : index
    %c0_128 = arith.constant 0 : index
    %c0_129 = arith.constant 0 : index
    %105 = vector.load %arg2[%c7, %c0_128, %c0_129] : memref<9x4x8xf32, #tpu.memory_space<vmem>>, vector<1x4x8xf32>
    %106 = vector.shape_cast %105 : vector<1x4x8xf32> to vector<4x8xf32>
    %cst_130 = arith.constant dense<0.000000e+00> : vector<128x8xf32>
    %107 = tpu.matmul %104, %106, %cst_130 {dimension_numbers = #tpu.dot_dimension_numbers<[1], [0], [0], [1], [0, 0, 1, 1], [], []>} : vector<128x4xf32>, vector<4x8xf32>, vector<128x8xf32> -> vector<128x8xf32>
    %108 = arith.addf %97, %107 : vector<128x8xf32>
    %c0_131 = arith.constant 0 : index
    %c2_132 = arith.constant 2 : index
    %c2_133 = arith.constant 2 : index
    %c0_134 = arith.constant 0 : index
    %109 = vector.load %arg9[%c0_131, %c2_132, %c2_133, %c0_134] : memref<2x10x10x4xf32, #tpu.memory_space<vmem>>, vector<1x8x8x4xf32>
    %110 = vector.shape_cast %109 : vector<1x8x8x4xf32> to vector<8x8x4xf32>
    %111 = vector.shape_cast %110 : vector<8x8x4xf32> to vector<64x4xf32>
    %c1_135 = arith.constant 1 : index
    %c2_136 = arith.constant 2 : index
    %c2_137 = arith.constant 2 : index
    %c0_138 = arith.constant 0 : index
    %112 = vector.load %arg9[%c1_135, %c2_136, %c2_137, %c0_138] : memref<2x10x10x4xf32, #tpu.memory_space<vmem>>, vector<1x8x8x4xf32>
    %113 = vector.shape_cast %112 : vector<1x8x8x4xf32> to vector<8x8x4xf32>
    %114 = vector.shape_cast %113 : vector<8x8x4xf32> to vector<64x4xf32>
    %115 = tpu.concatenate %111, %114 in 0 : vector<64x4xf32>, vector<64x4xf32> -> vector<128x4xf32>
    %c8 = arith.constant 8 : index
    %c0_139 = arith.constant 0 : index
    %c0_140 = arith.constant 0 : index
    %116 = vector.load %arg2[%c8, %c0_139, %c0_140] : memref<9x4x8xf32, #tpu.memory_space<vmem>>, vector<1x4x8xf32>
    %117 = vector.shape_cast %116 : vector<1x4x8xf32> to vector<4x8xf32>
    %cst_141 = arith.constant dense<0.000000e+00> : vector<128x8xf32>
    %118 = tpu.matmul %115, %117, %cst_141 {dimension_numbers = #tpu.dot_dimension_numbers<[1], [0], [0], [1], [0, 0, 1, 1], [], []>} : vector<128x4xf32>, vector<4x8xf32>, vector<128x8xf32> -> vector<128x8xf32>
    %119 = arith.addf %108, %118 : vector<128x8xf32>
    %c0_142 = arith.constant 0 : index
    %c0_143 = arith.constant 0 : index
    %120 = vector.load %arg3[%c0_142, %c0_143] : memref<1x8xf32, #tpu.memory_space<vmem>>, vector<1x8xf32>
    %121 = vector.broadcast %120 : vector<1x8xf32> to vector<128x8xf32>
    %122 = arith.mulf %119, %121 : vector<128x8xf32>
    %c0_144 = arith.constant 0 : index
    %c0_145 = arith.constant 0 : index
    %123 = vector.load %arg4[%c0_144, %c0_145] : memref<1x8xf32, #tpu.memory_space<vmem>>, vector<1x8xf32>
    %124 = vector.broadcast %123 : vector<1x8xf32> to vector<128x8xf32>
    %125 = arith.addf %122, %124 : vector<128x8xf32>
    %cst_146 = arith.constant 0.000000e+00 : f32
    %126 = vector.broadcast %cst_146 : f32 to vector<128x8xf32>
    %127 = arith.maximumf %125, %126 : vector<128x8xf32>
    %128 = vector.extract_strided_slice %127 {offsets = [0, 0], sizes = [64, 8], strides = [1, 1]} : vector<128x8xf32> to vector<64x8xf32>
    %129 = vector.shape_cast %128 : vector<64x8xf32> to vector<8x8x8xf32>
    %c0_147 = arith.constant 0 : index
    %c1_148 = arith.constant 1 : index
    %c1_149 = arith.constant 1 : index
    %c0_150 = arith.constant 0 : index
    %130 = vector.load %arg10[%c0_147, %c1_148, %c1_149, %c0_150] : memref<2x10x10x8xf32, #tpu.memory_space<vmem>>, vector<1x8x8x8xf32>
    %131 = vector.shape_cast %130 : vector<1x8x8x8xf32> to vector<8x8x8xf32>
    %132 = vector.shape_cast %129 : vector<8x8x8xf32> to vector<1x8x8x8xf32>
    tpu.vector_store %arg10[%c0_147, %c1_148, %c1_149, %c0_150], %132 {strides = array<i32>} : memref<2x10x10x8xf32, #tpu.memory_space<vmem>>, vector<1x8x8x8xf32>,
    %133 = vector.extract_strided_slice %127 {offsets = [64, 0], sizes = [64, 8], strides = [1, 1]} : vector<128x8xf32> to vector<64x8xf32>
    %134 = vector.shape_cast %133 : vector<64x8xf32> to vector<8x8x8xf32>
    %c1_151 = arith.constant 1 : index
    %c1_152 = arith.constant 1 : index
    %c1_153 = arith.constant 1 : index
    %c0_154 = arith.constant 0 : index
    %135 = vector.load %arg10[%c1_151, %c1_152, %c1_153, %c0_154] : memref<2x10x10x8xf32, #tpu.memory_space<vmem>>, vector<1x8x8x8xf32>
    %136 = vector.shape_cast %135 : vector<1x8x8x8xf32> to vector<8x8x8xf32>
    %137 = vector.shape_cast %134 : vector<8x8x8xf32> to vector<1x8x8x8xf32>
    tpu.vector_store %arg10[%c1_151, %c1_152, %c1_153, %c0_154], %137 {strides = array<i32>} : memref<2x10x10x8xf32, #tpu.memory_space<vmem>>, vector<1x8x8x8xf32>,
    %c0_155 = arith.constant 0 : index
    %c0_156 = arith.constant 0 : index
    %c0_157 = arith.constant 0 : index
    %c0_158 = arith.constant 0 : index
    %138 = vector.load %arg10[%c0_155, %c0_156, %c0_157, %c0_158] : memref<2x10x10x8xf32, #tpu.memory_space<vmem>>, vector<1x8x8x8xf32>
    %139 = vector.shape_cast %138 : vector<1x8x8x8xf32> to vector<8x8x8xf32>
    %140 = vector.shape_cast %139 : vector<8x8x8xf32> to vector<64x8xf32>
    %c1_159 = arith.constant 1 : index
    %c0_160 = arith.constant 0 : index
    %c0_161 = arith.constant 0 : index
    %c0_162 = arith.constant 0 : index
    %141 = vector.load %arg10[%c1_159, %c0_160, %c0_161, %c0_162] : memref<2x10x10x8xf32, #tpu.memory_space<vmem>>, vector<1x8x8x8xf32>
    %142 = vector.shape_cast %141 : vector<1x8x8x8xf32> to vector<8x8x8xf32>
    %143 = vector.shape_cast %142 : vector<8x8x8xf32> to vector<64x8xf32>
    %144 = tpu.concatenate %140, %143 in 0 : vector<64x8xf32>, vector<64x8xf32> -> vector<128x8xf32>
    %c0_163 = arith.constant 0 : index
    %c0_164 = arith.constant 0 : index
    %c0_165 = arith.constant 0 : index
    %145 = vector.load %arg5[%c0_163, %c0_164, %c0_165] : memref<9x8x8xf32, #tpu.memory_space<vmem>>, vector<1x8x8xf32>
    %146 = vector.shape_cast %145 : vector<1x8x8xf32> to vector<8x8xf32>
    %cst_166 = arith.constant dense<0.000000e+00> : vector<128x8xf32>
    %147 = tpu.matmul %144, %146, %cst_166 {dimension_numbers = #tpu.dot_dimension_numbers<[1], [0], [0], [1], [0, 0, 1, 1], [], []>} : vector<128x8xf32>, vector<8x8xf32>, vector<128x8xf32> -> vector<128x8xf32>
    %c0_167 = arith.constant 0 : index
    %c0_168 = arith.constant 0 : index
    %c1_169 = arith.constant 1 : index
    %c0_170 = arith.constant 0 : index
    %148 = vector.load %arg10[%c0_167, %c0_168, %c1_169, %c0_170] : memref<2x10x10x8xf32, #tpu.memory_space<vmem>>, vector<1x8x8x8xf32>
    %149 = vector.shape_cast %148 : vector<1x8x8x8xf32> to vector<8x8x8xf32>
    %150 = vector.shape_cast %149 : vector<8x8x8xf32> to vector<64x8xf32>
    %c1_171 = arith.constant 1 : index
    %c0_172 = arith.constant 0 : index
    %c1_173 = arith.constant 1 : index
    %c0_174 = arith.constant 0 : index
    %151 = vector.load %arg10[%c1_171, %c0_172, %c1_173, %c0_174] : memref<2x10x10x8xf32, #tpu.memory_space<vmem>>, vector<1x8x8x8xf32>
    %152 = vector.shape_cast %151 : vector<1x8x8x8xf32> to vector<8x8x8xf32>
    %153 = vector.shape_cast %152 : vector<8x8x8xf32> to vector<64x8xf32>
    %154 = tpu.concatenate %150, %153 in 0 : vector<64x8xf32>, vector<64x8xf32> -> vector<128x8xf32>
    %c1_175 = arith.constant 1 : index
    %c0_176 = arith.constant 0 : index
    %c0_177 = arith.constant 0 : index
    %155 = vector.load %arg5[%c1_175, %c0_176, %c0_177] : memref<9x8x8xf32, #tpu.memory_space<vmem>>, vector<1x8x8xf32>
    %156 = vector.shape_cast %155 : vector<1x8x8xf32> to vector<8x8xf32>
    %cst_178 = arith.constant dense<0.000000e+00> : vector<128x8xf32>
    %157 = tpu.matmul %154, %156, %cst_178 {dimension_numbers = #tpu.dot_dimension_numbers<[1], [0], [0], [1], [0, 0, 1, 1], [], []>} : vector<128x8xf32>, vector<8x8xf32>, vector<128x8xf32> -> vector<128x8xf32>
    %158 = arith.addf %147, %157 : vector<128x8xf32>
    %c0_179 = arith.constant 0 : index
    %c0_180 = arith.constant 0 : index
    %c2_181 = arith.constant 2 : index
    %c0_182 = arith.constant 0 : index
    %159 = vector.load %arg10[%c0_179, %c0_180, %c2_181, %c0_182] : memref<2x10x10x8xf32, #tpu.memory_space<vmem>>, vector<1x8x8x8xf32>
    %160 = vector.shape_cast %159 : vector<1x8x8x8xf32> to vector<8x8x8xf32>
    %161 = vector.shape_cast %160 : vector<8x8x8xf32> to vector<64x8xf32>
    %c1_183 = arith.constant 1 : index
    %c0_184 = arith.constant 0 : index
    %c2_185 = arith.constant 2 : index
    %c0_186 = arith.constant 0 : index
    %162 = vector.load %arg10[%c1_183, %c0_184, %c2_185, %c0_186] : memref<2x10x10x8xf32, #tpu.memory_space<vmem>>, vector<1x8x8x8xf32>
    %163 = vector.shape_cast %162 : vector<1x8x8x8xf32> to vector<8x8x8xf32>
    %164 = vector.shape_cast %163 : vector<8x8x8xf32> to vector<64x8xf32>
    %165 = tpu.concatenate %161, %164 in 0 : vector<64x8xf32>, vector<64x8xf32> -> vector<128x8xf32>
    %c2_187 = arith.constant 2 : index
    %c0_188 = arith.constant 0 : index
    %c0_189 = arith.constant 0 : index
    %166 = vector.load %arg5[%c2_187, %c0_188, %c0_189] : memref<9x8x8xf32, #tpu.memory_space<vmem>>, vector<1x8x8xf32>
    %167 = vector.shape_cast %166 : vector<1x8x8xf32> to vector<8x8xf32>
    %cst_190 = arith.constant dense<0.000000e+00> : vector<128x8xf32>
    %168 = tpu.matmul %165, %167, %cst_190 {dimension_numbers = #tpu.dot_dimension_numbers<[1], [0], [0], [1], [0, 0, 1, 1], [], []>} : vector<128x8xf32>, vector<8x8xf32>, vector<128x8xf32> -> vector<128x8xf32>
    %169 = arith.addf %158, %168 : vector<128x8xf32>
    %c0_191 = arith.constant 0 : index
    %c1_192 = arith.constant 1 : index
    %c0_193 = arith.constant 0 : index
    %c0_194 = arith.constant 0 : index
    %170 = vector.load %arg10[%c0_191, %c1_192, %c0_193, %c0_194] : memref<2x10x10x8xf32, #tpu.memory_space<vmem>>, vector<1x8x8x8xf32>
    %171 = vector.shape_cast %170 : vector<1x8x8x8xf32> to vector<8x8x8xf32>
    %172 = vector.shape_cast %171 : vector<8x8x8xf32> to vector<64x8xf32>
    %c1_195 = arith.constant 1 : index
    %c1_196 = arith.constant 1 : index
    %c0_197 = arith.constant 0 : index
    %c0_198 = arith.constant 0 : index
    %173 = vector.load %arg10[%c1_195, %c1_196, %c0_197, %c0_198] : memref<2x10x10x8xf32, #tpu.memory_space<vmem>>, vector<1x8x8x8xf32>
    %174 = vector.shape_cast %173 : vector<1x8x8x8xf32> to vector<8x8x8xf32>
    %175 = vector.shape_cast %174 : vector<8x8x8xf32> to vector<64x8xf32>
    %176 = tpu.concatenate %172, %175 in 0 : vector<64x8xf32>, vector<64x8xf32> -> vector<128x8xf32>
    %c3_199 = arith.constant 3 : index
    %c0_200 = arith.constant 0 : index
    %c0_201 = arith.constant 0 : index
    %177 = vector.load %arg5[%c3_199, %c0_200, %c0_201] : memref<9x8x8xf32, #tpu.memory_space<vmem>>, vector<1x8x8xf32>
    %178 = vector.shape_cast %177 : vector<1x8x8xf32> to vector<8x8xf32>
    %cst_202 = arith.constant dense<0.000000e+00> : vector<128x8xf32>
    %179 = tpu.matmul %176, %178, %cst_202 {dimension_numbers = #tpu.dot_dimension_numbers<[1], [0], [0], [1], [0, 0, 1, 1], [], []>} : vector<128x8xf32>, vector<8x8xf32>, vector<128x8xf32> -> vector<128x8xf32>
    %180 = arith.addf %169, %179 : vector<128x8xf32>
    %c0_203 = arith.constant 0 : index
    %c1_204 = arith.constant 1 : index
    %c1_205 = arith.constant 1 : index
    %c0_206 = arith.constant 0 : index
    %181 = vector.load %arg10[%c0_203, %c1_204, %c1_205, %c0_206] : memref<2x10x10x8xf32, #tpu.memory_space<vmem>>, vector<1x8x8x8xf32>
    %182 = vector.shape_cast %181 : vector<1x8x8x8xf32> to vector<8x8x8xf32>
    %183 = vector.shape_cast %182 : vector<8x8x8xf32> to vector<64x8xf32>
    %c1_207 = arith.constant 1 : index
    %c1_208 = arith.constant 1 : index
    %c1_209 = arith.constant 1 : index
    %c0_210 = arith.constant 0 : index
    %184 = vector.load %arg10[%c1_207, %c1_208, %c1_209, %c0_210] : memref<2x10x10x8xf32, #tpu.memory_space<vmem>>, vector<1x8x8x8xf32>
    %185 = vector.shape_cast %184 : vector<1x8x8x8xf32> to vector<8x8x8xf32>
    %186 = vector.shape_cast %185 : vector<8x8x8xf32> to vector<64x8xf32>
    %187 = tpu.concatenate %183, %186 in 0 : vector<64x8xf32>, vector<64x8xf32> -> vector<128x8xf32>
    %c4_211 = arith.constant 4 : index
    %c0_212 = arith.constant 0 : index
    %c0_213 = arith.constant 0 : index
    %188 = vector.load %arg5[%c4_211, %c0_212, %c0_213] : memref<9x8x8xf32, #tpu.memory_space<vmem>>, vector<1x8x8xf32>
    %189 = vector.shape_cast %188 : vector<1x8x8xf32> to vector<8x8xf32>
    %cst_214 = arith.constant dense<0.000000e+00> : vector<128x8xf32>
    %190 = tpu.matmul %187, %189, %cst_214 {dimension_numbers = #tpu.dot_dimension_numbers<[1], [0], [0], [1], [0, 0, 1, 1], [], []>} : vector<128x8xf32>, vector<8x8xf32>, vector<128x8xf32> -> vector<128x8xf32>
    %191 = arith.addf %180, %190 : vector<128x8xf32>
    %c0_215 = arith.constant 0 : index
    %c1_216 = arith.constant 1 : index
    %c2_217 = arith.constant 2 : index
    %c0_218 = arith.constant 0 : index
    %192 = vector.load %arg10[%c0_215, %c1_216, %c2_217, %c0_218] : memref<2x10x10x8xf32, #tpu.memory_space<vmem>>, vector<1x8x8x8xf32>
    %193 = vector.shape_cast %192 : vector<1x8x8x8xf32> to vector<8x8x8xf32>
    %194 = vector.shape_cast %193 : vector<8x8x8xf32> to vector<64x8xf32>
    %c1_219 = arith.constant 1 : index
    %c1_220 = arith.constant 1 : index
    %c2_221 = arith.constant 2 : index
    %c0_222 = arith.constant 0 : index
    %195 = vector.load %arg10[%c1_219, %c1_220, %c2_221, %c0_222] : memref<2x10x10x8xf32, #tpu.memory_space<vmem>>, vector<1x8x8x8xf32>
    %196 = vector.shape_cast %195 : vector<1x8x8x8xf32> to vector<8x8x8xf32>
    %197 = vector.shape_cast %196 : vector<8x8x8xf32> to vector<64x8xf32>
    %198 = tpu.concatenate %194, %197 in 0 : vector<64x8xf32>, vector<64x8xf32> -> vector<128x8xf32>
    %c5_223 = arith.constant 5 : index
    %c0_224 = arith.constant 0 : index
    %c0_225 = arith.constant 0 : index
    %199 = vector.load %arg5[%c5_223, %c0_224, %c0_225] : memref<9x8x8xf32, #tpu.memory_space<vmem>>, vector<1x8x8xf32>
    %200 = vector.shape_cast %199 : vector<1x8x8xf32> to vector<8x8xf32>
    %cst_226 = arith.constant dense<0.000000e+00> : vector<128x8xf32>
    %201 = tpu.matmul %198, %200, %cst_226 {dimension_numbers = #tpu.dot_dimension_numbers<[1], [0], [0], [1], [0, 0, 1, 1], [], []>} : vector<128x8xf32>, vector<8x8xf32>, vector<128x8xf32> -> vector<128x8xf32>
    %202 = arith.addf %191, %201 : vector<128x8xf32>
    %c0_227 = arith.constant 0 : index
    %c2_228 = arith.constant 2 : index
    %c0_229 = arith.constant 0 : index
    %c0_230 = arith.constant 0 : index
    %203 = vector.load %arg10[%c0_227, %c2_228, %c0_229, %c0_230] : memref<2x10x10x8xf32, #tpu.memory_space<vmem>>, vector<1x8x8x8xf32>
    %204 = vector.shape_cast %203 : vector<1x8x8x8xf32> to vector<8x8x8xf32>
    %205 = vector.shape_cast %204 : vector<8x8x8xf32> to vector<64x8xf32>
    %c1_231 = arith.constant 1 : index
    %c2_232 = arith.constant 2 : index
    %c0_233 = arith.constant 0 : index
    %c0_234 = arith.constant 0 : index
    %206 = vector.load %arg10[%c1_231, %c2_232, %c0_233, %c0_234] : memref<2x10x10x8xf32, #tpu.memory_space<vmem>>, vector<1x8x8x8xf32>
    %207 = vector.shape_cast %206 : vector<1x8x8x8xf32> to vector<8x8x8xf32>
    %208 = vector.shape_cast %207 : vector<8x8x8xf32> to vector<64x8xf32>
    %209 = tpu.concatenate %205, %208 in 0 : vector<64x8xf32>, vector<64x8xf32> -> vector<128x8xf32>
    %c6_235 = arith.constant 6 : index
    %c0_236 = arith.constant 0 : index
    %c0_237 = arith.constant 0 : index
    %210 = vector.load %arg5[%c6_235, %c0_236, %c0_237] : memref<9x8x8xf32, #tpu.memory_space<vmem>>, vector<1x8x8xf32>
    %211 = vector.shape_cast %210 : vector<1x8x8xf32> to vector<8x8xf32>
    %cst_238 = arith.constant dense<0.000000e+00> : vector<128x8xf32>
    %212 = tpu.matmul %209, %211, %cst_238 {dimension_numbers = #tpu.dot_dimension_numbers<[1], [0], [0], [1], [0, 0, 1, 1], [], []>} : vector<128x8xf32>, vector<8x8xf32>, vector<128x8xf32> -> vector<128x8xf32>
    %213 = arith.addf %202, %212 : vector<128x8xf32>
    %c0_239 = arith.constant 0 : index
    %c2_240 = arith.constant 2 : index
    %c1_241 = arith.constant 1 : index
    %c0_242 = arith.constant 0 : index
    %214 = vector.load %arg10[%c0_239, %c2_240, %c1_241, %c0_242] : memref<2x10x10x8xf32, #tpu.memory_space<vmem>>, vector<1x8x8x8xf32>
    %215 = vector.shape_cast %214 : vector<1x8x8x8xf32> to vector<8x8x8xf32>
    %216 = vector.shape_cast %215 : vector<8x8x8xf32> to vector<64x8xf32>
    %c1_243 = arith.constant 1 : index
    %c2_244 = arith.constant 2 : index
    %c1_245 = arith.constant 1 : index
    %c0_246 = arith.constant 0 : index
    %217 = vector.load %arg10[%c1_243, %c2_244, %c1_245, %c0_246] : memref<2x10x10x8xf32, #tpu.memory_space<vmem>>, vector<1x8x8x8xf32>
    %218 = vector.shape_cast %217 : vector<1x8x8x8xf32> to vector<8x8x8xf32>
    %219 = vector.shape_cast %218 : vector<8x8x8xf32> to vector<64x8xf32>
    %220 = tpu.concatenate %216, %219 in 0 : vector<64x8xf32>, vector<64x8xf32> -> vector<128x8xf32>
    %c7_247 = arith.constant 7 : index
    %c0_248 = arith.constant 0 : index
    %c0_249 = arith.constant 0 : index
    %221 = vector.load %arg5[%c7_247, %c0_248, %c0_249] : memref<9x8x8xf32, #tpu.memory_space<vmem>>, vector<1x8x8xf32>
    %222 = vector.shape_cast %221 : vector<1x8x8xf32> to vector<8x8xf32>
    %cst_250 = arith.constant dense<0.000000e+00> : vector<128x8xf32>
    %223 = tpu.matmul %220, %222, %cst_250 {dimension_numbers = #tpu.dot_dimension_numbers<[1], [0], [0], [1], [0, 0, 1, 1], [], []>} : vector<128x8xf32>, vector<8x8xf32>, vector<128x8xf32> -> vector<128x8xf32>
    %224 = arith.addf %213, %223 : vector<128x8xf32>
    %c0_251 = arith.constant 0 : index
    %c2_252 = arith.constant 2 : index
    %c2_253 = arith.constant 2 : index
    %c0_254 = arith.constant 0 : index
    %225 = vector.load %arg10[%c0_251, %c2_252, %c2_253, %c0_254] : memref<2x10x10x8xf32, #tpu.memory_space<vmem>>, vector<1x8x8x8xf32>
    %226 = vector.shape_cast %225 : vector<1x8x8x8xf32> to vector<8x8x8xf32>
    %227 = vector.shape_cast %226 : vector<8x8x8xf32> to vector<64x8xf32>
    %c1_255 = arith.constant 1 : index
    %c2_256 = arith.constant 2 : index
    %c2_257 = arith.constant 2 : index
    %c0_258 = arith.constant 0 : index
    %228 = vector.load %arg10[%c1_255, %c2_256, %c2_257, %c0_258] : memref<2x10x10x8xf32, #tpu.memory_space<vmem>>, vector<1x8x8x8xf32>
    %229 = vector.shape_cast %228 : vector<1x8x8x8xf32> to vector<8x8x8xf32>
    %230 = vector.shape_cast %229 : vector<8x8x8xf32> to vector<64x8xf32>
    %231 = tpu.concatenate %227, %230 in 0 : vector<64x8xf32>, vector<64x8xf32> -> vector<128x8xf32>
    %c8_259 = arith.constant 8 : index
    %c0_260 = arith.constant 0 : index
    %c0_261 = arith.constant 0 : index
    %232 = vector.load %arg5[%c8_259, %c0_260, %c0_261] : memref<9x8x8xf32, #tpu.memory_space<vmem>>, vector<1x8x8xf32>
    %233 = vector.shape_cast %232 : vector<1x8x8xf32> to vector<8x8xf32>
    %cst_262 = arith.constant dense<0.000000e+00> : vector<128x8xf32>
    %234 = tpu.matmul %231, %233, %cst_262 {dimension_numbers = #tpu.dot_dimension_numbers<[1], [0], [0], [1], [0, 0, 1, 1], [], []>} : vector<128x8xf32>, vector<8x8xf32>, vector<128x8xf32> -> vector<128x8xf32>
    %235 = arith.addf %224, %234 : vector<128x8xf32>
    %c0_263 = arith.constant 0 : index
    %c0_264 = arith.constant 0 : index
    %236 = vector.load %arg6[%c0_263, %c0_264] : memref<1x8xf32, #tpu.memory_space<vmem>>, vector<1x8xf32>
    %237 = vector.broadcast %236 : vector<1x8xf32> to vector<128x8xf32>
    %238 = arith.mulf %235, %237 : vector<128x8xf32>
    %c0_265 = arith.constant 0 : index
    %c0_266 = arith.constant 0 : index
    %239 = vector.load %arg7[%c0_265, %c0_266] : memref<1x8xf32, #tpu.memory_space<vmem>>, vector<1x8xf32>
    %240 = vector.broadcast %239 : vector<1x8xf32> to vector<128x8xf32>
    %241 = arith.addf %238, %240 : vector<128x8xf32>
    %cst_267 = arith.constant 0.000000e+00 : f32
    %242 = vector.broadcast %cst_267 : f32 to vector<128x8xf32>
    %243 = arith.maximumf %241, %242 : vector<128x8xf32>
    %244 = vector.extract_strided_slice %243 {offsets = [0, 0], sizes = [64, 8], strides = [1, 1]} : vector<128x8xf32> to vector<64x8xf32>
    %245 = tpu.transpose %244, [1, 0] : vector<64x8xf32> -> vector<8x64xf32>
    %c0_268 = arith.constant 0 : index
    %c0_269 = arith.constant 0 : index
    %c0_270 = arith.constant 0 : index
    %246 = vector.load %arg8[%c0_268, %c0_269, %c0_270] : memref<2x8x64xf32, #tpu.memory_space<vmem>>, vector<1x8x64xf32>
    %247 = vector.shape_cast %246 : vector<1x8x64xf32> to vector<8x64xf32>
    %248 = vector.shape_cast %245 : vector<8x64xf32> to vector<1x8x64xf32>
    tpu.vector_store %arg8[%c0_268, %c0_269, %c0_270], %248 {strides = array<i32>} : memref<2x8x64xf32, #tpu.memory_space<vmem>>, vector<1x8x64xf32>,
    %249 = vector.extract_strided_slice %243 {offsets = [64, 0], sizes = [64, 8], strides = [1, 1]} : vector<128x8xf32> to vector<64x8xf32>
    %250 = tpu.transpose %249, [1, 0] : vector<64x8xf32> -> vector<8x64xf32>
    %c1_271 = arith.constant 1 : index
    %c0_272 = arith.constant 0 : index
    %c0_273 = arith.constant 0 : index
    %251 = vector.load %arg8[%c1_271, %c0_272, %c0_273] : memref<2x8x64xf32, #tpu.memory_space<vmem>>, vector<1x8x64xf32>
    %252 = vector.shape_cast %251 : vector<1x8x64xf32> to vector<8x64xf32>
    %253 = vector.shape_cast %250 : vector<8x64xf32> to vector<1x8x64xf32>
    tpu.vector_store %arg8[%c1_271, %c0_272, %c0_273], %253 {strides = array<i32>} : memref<2x8x64xf32, #tpu.memory_space<vmem>>, vector<1x8x64xf32>,
    return
  }
  func.func @transform_0(%arg0: i32) -> (i32, i32, i32, i32, i32) {
    %c0_i32 = arith.constant 0 : i32
    %c0_i32_0 = arith.constant 0 : i32
    %c0_i32_1 = arith.constant 0 : i32
    %c0_i32_2 = arith.constant 0 : i32
    %c0_i32_3 = arith.constant 0 : i32
    return %arg0, %c0_i32, %c0_i32_0, %c0_i32_1, %c0_i32_2 : i32, i32, i32, i32, i32
  }
  func.func @transform_1(%arg0: i32) -> (i32, i32, i32) {
    %c0_i32 = arith.constant 0 : i32
    %c0_i32_0 = arith.constant 0 : i32
    %c0_i32_1 = arith.constant 0 : i32
    %c0_i32_2 = arith.constant 0 : i32
    return %c0_i32, %c0_i32_0, %c0_i32_1 : i32, i32, i32
  }
  func.func @transform_2(%arg0: i32) -> (i32, i32) {
    %c0_i32 = arith.constant 0 : i32
    %c0_i32_0 = arith.constant 0 : i32
    %c0_i32_1 = arith.constant 0 : i32
    return %c0_i32, %c0_i32_0 : i32, i32
  }
  func.func @transform_3(%arg0: i32) -> (i32, i32) {
    %c0_i32 = arith.constant 0 : i32
    %c0_i32_0 = arith.constant 0 : i32
    %c0_i32_1 = arith.constant 0 : i32
    return %c0_i32, %c0_i32_0 : i32, i32
  }
  func.func @transform_4(%arg0: i32) -> (i32, i32, i32) {
    %c0_i32 = arith.constant 0 : i32
    %c0_i32_0 = arith.constant 0 : i32
    %c0_i32_1 = arith.constant 0 : i32
    %c0_i32_2 = arith.constant 0 : i32
    return %c0_i32, %c0_i32_0, %c0_i32_1 : i32, i32, i32
  }
  func.func @transform_5(%arg0: i32) -> (i32, i32) {
    %c0_i32 = arith.constant 0 : i32
    %c0_i32_0 = arith.constant 0 : i32
    %c0_i32_1 = arith.constant 0 : i32
    return %c0_i32, %c0_i32_0 : i32, i32
  }
  func.func @transform_6(%arg0: i32) -> (i32, i32) {
    %c0_i32 = arith.constant 0 : i32
    %c0_i32_0 = arith.constant 0 : i32
    %c0_i32_1 = arith.constant 0 : i32
    return %c0_i32, %c0_i32_0 : i32, i32
  }
  func.func @transform_7(%arg0: i32) -> (i32, i32, i32) {
    %c0_i32 = arith.constant 0 : i32
    %c0_i32_0 = arith.constant 0 : i32
    %c0_i32_1 = arith.constant 0 : i32
    return %arg0, %c0_i32, %c0_i32_0 : i32, i32, i32
  }
}

</mosaic_0001>

<bundles_post_ra>
// kernel: down_forward.1
= control target key start
LH: loop header
LB: loop body
LE: loop exit
PB: predicated region body
PF: predicated region fallthrough
CT: control target
= control target key end

     0   :  { %vm26_vm0 = vcmask 31744   ;;  %vm28_vm1 = vcmask 25600   ;;  %v5894_v3 = vmov 0.0   ;;  %vm37_vm2 = vcmask 24576   ;;  %s5895_s17 = smov 124   ;;  %s7206_s0 = inlined_call_operand.vmem [shape: f32[2,8,2,8,8], index: 0, kind: input, shape index: {}]   ;;  %s7207_s1 = inlined_call_operand.vmem [shape: f32[9,4,8], index: 1, kind: input, shape index: {}]   ;;  %s7208_s4 = inlined_call_operand.vmem [shape: f32[9,8,8], index: 4, kind: input, shape index: {}]   ;;  %s7209_s2 = inlined_call_operand.vmem [shape: f32[1,8], index: 2, kind: input, shape index: {}]   ;;  %s7210_s3 = inlined_call_operand.vmem [shape: f32[1,8], index: 3, kind: input, shape index: {}]   ;;  %s7211_s5 = inlined_call_operand.vmem [shape: f32[1,8], index: 5, kind: input, shape index: {}]   ;;  %s7212_s6 = inlined_call_operand.vmem [shape: f32[1,8], index: 6, kind: input, shape index: {}]   ;;  %s7213_s7 = inlined_call_operand.vmem [shape: f32[2,8,64], index: 7, kind: output, shape index: {}]  }
   0x1   :  { %v130_v0 = vld [vmem:[%s7206_s0] sm:$0xff]  ;;  %v131_v1 = vld [vmem:[%s7206_s0 + $0x8] sm:$0xff]  ;;  %27 = vst.msk [vmem:[#allocation2] sm:$0xff] %vm26_vm0, %v5894_v3  ;;  %30 = vst.msk [vmem:[#allocation2 + $0xa0] sm:$0xff] %vm26_vm0, %v5894_v3  ;;  %vm359_vm3 = vcmask 1043456   ;;  %vm78_vm4 = vcmask 64512  }
   0x2   :  { %v134_v2 = vld [vmem:[%s7206_s0 + $0x20] sm:$0xff]  ;;  %29 = vst.msk [vmem:[#allocation2 + $0x8] sm:$0x3] %vm28_vm1, %v5894_v3  ;;  %31 = vst.msk [vmem:[#allocation2 + $0xa8] sm:$0x3] %vm28_vm1, %v5894_v3  ;;  %v5957_v4 = vmax.f32 %v130_v0, %v131_v1  ;;  %v135_v5 = vld [vmem:[%s7206_s0 + $0x28] sm:$0xff] }
   0x3   :  { %33 = vst.msk [vmem:[#allocation2 + $0x90] sm:$0xff] %vm26_vm0, %v5894_v3  ;;  %35 = vst.msk [vmem:[#allocation2 + $0x130] sm:$0xff] %vm26_vm0, %v5894_v3  ;;  %v132_v6 = vld [vmem:[%s7206_s0 + $0x10] sm:$0xff]  ;;  %v133_v7 = vld [vmem:[%s7206_s0 + $0x18] sm:$0xff]  ;;  %v6048_v8 = vmax.f32 %v134_v2, %v135_v5  ;;  %vm80_vm5 = vcmask 58368   ;;  %vm89_vm6 = vcmask 57344  }
   0x4   :  { %34 = vst.msk [vmem:[#allocation2 + $0x98] sm:$0x3] %vm28_vm1, %v5894_v3  ;;  %36 = vst.msk [vmem:[#allocation2 + $0x138] sm:$0x3] %vm28_vm1, %v5894_v3  ;;  %v136_v9 = vld [vmem:[%s7206_s0 + $0x30] sm:$0xff]  ;;  %v137_v10 = vld [vmem:[%s7206_s0 + $0x38] sm:$0xff]  ;;  %194 = vrot.lane.b32.xlu0 %v5957_v4, %s5895_s17  ;;  %v6058_v11 = vmax.f32 %v132_v6, %v133_v7 }
   0x5   :  { %58 = vst.msk [vmem:[#allocation2 + $0x9] sm:$0x1] %vm37_vm2, %v5894_v3  ;;  %38 = vst.msk [vmem:[#allocation2] sm:$0x1] %vm37_vm2, %v5894_v3  ;;  %198 = vrot.lane.b32.xlu1 %v6048_v8, %s5895_s17  ;;  %v6062_v12 = vmax.f32 %v136_v9, %v137_v10  ;;  %v138_v13 = vld [vmem:[%s7206_s0 + $0x40] sm:$0xff]  ;;  %v139_v14 = vld [vmem:[%s7206_s0 + $0x48] sm:$0xff] }
   0x6   :  { %39 = vst.msk [vmem:[#allocation2 + $0x10] sm:$0x1] %vm37_vm2, %v5894_v3  ;;  %40 = vst.msk [vmem:[#allocation2 + $0x20] sm:$0x1] %vm37_vm2, %v5894_v3  ;;  %v140_v15 = vld [vmem:[%s7206_s0 + $0x50] sm:$0xff]  ;;  %v141_v16 = vld [vmem:[%s7206_s0 + $0x58] sm:$0xff]  ;;  %v6078_v17 = vmax.f32 %v138_v13, %v139_v14 }
   0x7   :  { %41 = vst.msk [vmem:[#allocation2 + $0x30] sm:$0x1] %vm37_vm2, %v5894_v3  ;;  %42 = vst.msk [vmem:[#allocation2 + $0x40] sm:$0x1] %vm37_vm2, %v5894_v3  ;;  %v6082_v18 = vmax.f32 %v140_v15, %v141_v16  ;;  %v142_v19 = vld [vmem:[%s7206_s0 + $0x60] sm:$0xff]  ;;  %v143_v20 = vld [vmem:[%s7206_s0 + $0x68] sm:$0xff] }
   0x8   :  { %43 = vst.msk [vmem:[#allocation2 + $0x50] sm:$0x1] %vm37_vm2, %v5894_v3  ;;  %44 = vst.msk [vmem:[#allocation2 + $0x60] sm:$0x1] %vm37_vm2, %v5894_v3  ;;  %196 = vrot.lane.b32.xlu0 %v6058_v11, %s5895_s17  ;;  %v146_v21 = vld [vmem:[%s7206_s0 + $0x80] sm:$0xff]  ;;  %v147_v22 = vld [vmem:[%s7206_s0 + $0x88] sm:$0xff]  ;;  %v6106_v26 = vmax.f32 %v142_v19, %v143_v20 }
   0x9   :  { %45 = vst.msk [vmem:[#allocation2 + $0x70] sm:$0x1] %vm37_vm2, %v5894_v3  ;;  %46 = vst.msk [vmem:[#allocation2 + $0x80] sm:$0x1] %vm37_vm2, %v5894_v3  ;;  %200 = vrot.lane.b32.xlu1 %v6062_v12, %s5895_s17  ;;  %v4544_v23 = vld [vmem:[%s7207_s1 + $0x4] sm:$0xf]  ;;  %v6111_v27 = vmax.f32 %v146_v21, %v147_v22 }
   0xa   :  { %49 = vst.msk [vmem:[#allocation2 + $0xb0] sm:$0x1] %vm37_vm2, %v5894_v3  ;;  %50 = vst.msk [vmem:[#allocation2 + $0xc0] sm:$0x1] %vm37_vm2, %v5894_v3  ;;  %v293_v24 = vld [vmem:[#allocation2 + $0x1] sm:$0xff]  ;;  %5168 = vmatprep.subr.msk.mxu0 %vm359_vm3, %v4544_v23  ;;  %v148_v28 = vld [vmem:[%s7206_s0 + $0x90] sm:$0xff] }
   0xb   :  { %51 = vst.msk [vmem:[#allocation2 + $0xd0] sm:$0x1] %vm37_vm2, %v5894_v3  ;;  %52 = vst.msk [vmem:[#allocation2 + $0xe0] sm:$0x1] %vm37_vm2, %v5894_v3  ;;  %v6102_v25 = vld [vmem:[%s7207_s1] sm:$0xf]  ;;  %5169 = vmatpush3.msk.msra.mxu0 %vm359_vm3, %v4544_v23  ;;  %5170 = vmatprep.mubr.msk.f32.mxu0 %vm26_vm0, %v293_v24 }
   0xc   :  { %53 = vst.msk [vmem:[#allocation2 + $0xf0] sm:$0x1] %vm37_vm2, %v5894_v3  ;;  %54 = vst.msk [vmem:[#allocation2 + $0x100] sm:$0x1] %vm37_vm2, %v5894_v3  ;;  %202 = vrot.lane.b32.xlu0 %v6078_v17, %s5895_s17  ;;  %v149_v29 = vld [vmem:[%s7206_s0 + $0x98] sm:$0xff]  ;;  %v150_v30 = vld [vmem:[%s7206_s0 + $0xa0] sm:$0xff]  ;;  %5194 = vmatprep.subr.msk.mxu0 %vm359_vm3, %v6102_v25 }
   0xd   :  { %55 = vst.msk [vmem:[#allocation2 + $0x110] sm:$0x1] %vm37_vm2, %v5894_v3  ;;  %56 = vst.msk [vmem:[#allocation2 + $0x120] sm:$0x1] %vm37_vm2, %v5894_v3  ;;  %204 = vrot.lane.b32.xlu1 %v6082_v18, %s5895_s17  ;;  %v151_v31 = vld [vmem:[%s7206_s0 + $0xa8] sm:$0xff]  ;;  %v6131_v32 = vmax.f32 %v148_v28, %v149_v29  ;;  %v152_v34 = vld [vmem:[%s7206_s0 + $0xb0] sm:$0xff] }
   0xe   :  { %59 = vst.msk [vmem:[#allocation2 + $0x19] sm:$0x1] %vm37_vm2, %v5894_v3  ;;  %60 = vst.msk [vmem:[#allocation2 + $0x29] sm:$0x1] %vm37_vm2, %v5894_v3  ;;  %v6135_v33 = vmax.f32 %v150_v30, %v151_v31  ;;  %v153_v35 = vld [vmem:[%s7206_s0 + $0xb8] sm:$0xff]  ;;  %v154_v36 = vld [vmem:[%s7206_s0 + $0xc0] sm:$0xff] }
   0xf   :  { %61 = vst.msk [vmem:[#allocation2 + $0x39] sm:$0x1] %vm37_vm2, %v5894_v3  ;;  %62 = vst.msk [vmem:[#allocation2 + $0x49] sm:$0x1] %vm37_vm2, %v5894_v3  ;;  %v155_v37 = vld [vmem:[%s7206_s0 + $0xc8] sm:$0xff]  ;;  %v6151_v38 = vmax.f32 %v152_v34, %v153_v35  ;;  %v156_v40 = vld [vmem:[%s7206_s0 + $0xd0] sm:$0xff] }
  0x10   :  { %63 = vst.msk [vmem:[#allocation2 + $0x59] sm:$0x1] %vm37_vm2, %v5894_v3  ;;  %64 = vst.msk [vmem:[#allocation2 + $0x69] sm:$0x1] %vm37_vm2, %v5894_v3  ;;  %206 = vrot.lane.b32.xlu0 %v6106_v26, %s5895_s17  ;;  %v6155_v39 = vmax.f32 %v154_v36, %v155_v37  ;;  %v157_v41 = vld [vmem:[%s7206_s0 + $0xd8] sm:$0xff]  ;;  %v158_v42 = vld [vmem:[%s7206_s0 + $0xe0] sm:$0xff] }
  0x11   :  { %65 = vst.msk [vmem:[#allocation2 + $0x79] sm:$0x1] %vm37_vm2, %v5894_v3  ;;  %66 = vst.msk [vmem:[#allocation2 + $0x89] sm:$0x1] %vm37_vm2, %v5894_v3  ;;  %210 = vrot.lane.b32.xlu1 %v6111_v27, %s5895_s17  ;;  %v159_v43 = vld [vmem:[%s7206_s0 + $0xe8] sm:$0xff]  ;;  %v6171_v44 = vmax.f32 %v156_v40, %v157_v41  ;;  %v144_v46 = vld [vmem:[%s7206_s0 + $0x70] sm:$0xff] }
  0x12   :  { %69 = vst.msk [vmem:[#allocation2 + $0xb9] sm:$0x1] %vm37_vm2, %v5894_v3  ;;  %70 = vst.msk [vmem:[#allocation2 + $0xc9] sm:$0x1] %vm37_vm2, %v5894_v3  ;;  %v6175_v45 = vmax.f32 %v158_v42, %v159_v43  ;;  %v145_v47 = vld [vmem:[%s7206_s0 + $0x78] sm:$0xff]  ;;  %v160_v48 = vld [vmem:[%s7206_s0 + $0xf0] sm:$0xff] }
  0x13   :  { %71 = vst.msk [vmem:[#allocation2 + $0xd9] sm:$0x1] %vm37_vm2, %v5894_v3  ;;  %72 = vst.msk [vmem:[#allocation2 + $0xe9] sm:$0x1] %vm37_vm2, %v5894_v3  ;;  %v161_v49 = vld [vmem:[%s7206_s0 + $0xf8] sm:$0xff]  ;;  %v6191_v50 = vmax.f32 %v144_v46, %v145_v47  ;;  %v301_v21 = vld [vmem:[#allocation2 + $0xa1] sm:$0xff] }
  0x14   :  { %73 = vst.msk [vmem:[#allocation2 + $0xf9] sm:$0x1] %vm37_vm2, %v5894_v3  ;;  %74 = vst.msk [vmem:[#allocation2 + $0x109] sm:$0x1] %vm37_vm2, %v5894_v3  ;;  %212 = vrot.lane.b32.xlu0 %v6131_v32, %s5895_s17  ;;  %v6195_v51 = vmax.f32 %v160_v48, %v161_v49  ;;  %v6216_v1 = vld [vmem:[%s7207_s1 + $0x8] sm:$0xf] }
  0x15   :  { %75 = vst.msk [vmem:[#allocation2 + $0x119] sm:$0x1] %vm37_vm2, %v5894_v3  ;;  %76 = vst.msk [vmem:[#allocation2 + $0x129] sm:$0x1] %vm37_vm2, %v5894_v3  ;;  %214 = vrot.lane.b32.xlu1 %v6135_v33, %s5895_s17  ;;  %v275_v37 = vld [vmem:[#allocation2] sm:$0xff]  ;;  %vm4504_vm7 = vcmask 523264  }
  0x16   :  { %47 = vst.msk [vmem:[#allocation2 + $0x90] sm:$0x1] %vm37_vm2, %v5894_v3  ;;  %48 = vst.msk [vmem:[#allocation2 + $0xa0] sm:$0x1] %vm37_vm2, %v5894_v3 }
  0x17   :  { %57 = vst.msk [vmem:[#allocation2 + $0x130] sm:$0x1] %vm37_vm2, %v5894_v3  ;;  %67 = vst.msk [vmem:[#allocation2 + $0x99] sm:$0x1] %vm37_vm2, %v5894_v3 }
  0x18   :  { %68 = vst.msk [vmem:[#allocation2 + $0xa9] sm:$0x1] %vm37_vm2, %v5894_v3  ;;  %77 = vst.msk [vmem:[#allocation2 + $0x139] sm:$0x1] %vm37_vm2, %v5894_v3  ;;  %216 = vrot.lane.b32.xlu0 %v6151_v38, %s5895_s17 }
  0x19   :  { %218 = vrot.lane.b32.xlu1 %v6155_v39, %s5895_s17  ;;  %79 = vst.msk [vmem:[#allocation3] sm:$0xff] %vm78_vm4, %v5894_v3  ;;  %82 = vst.msk [vmem:[#allocation3 + $0xa0] sm:$0xff] %vm78_vm4, %v5894_v3 }
  0x1a   :  { %85 = vst.msk [vmem:[#allocation3 + $0x90] sm:$0xff] %vm78_vm4, %v5894_v3  ;;  %87 = vst.msk [vmem:[#allocation3 + $0x130] sm:$0xff] %vm78_vm4, %v5894_v3 }
  0x1b   :  { %81 = vst.msk [vmem:[#allocation3 + $0x8] sm:$0x3] %vm80_vm5, %v5894_v3  ;;  %83 = vst.msk [vmem:[#allocation3 + $0xa8] sm:$0x3] %vm80_vm5, %v5894_v3 }
  0x1c   :  { %220 = vrot.lane.b32.xlu0 %v6171_v44, %s5895_s17  ;;  %86 = vst.msk [vmem:[#allocation3 + $0x98] sm:$0x3] %vm80_vm5, %v5894_v3  ;;  %88 = vst.msk [vmem:[#allocation3 + $0x138] sm:$0x3] %vm80_vm5, %v5894_v3 }
  0x1d   :  { %222 = vrot.lane.b32.xlu1 %v6175_v45, %s5895_s17  ;;  %90 = vst.msk [vmem:[#allocation3] sm:$0x1] %vm89_vm6, %v5894_v3  ;;  %91 = vst.msk [vmem:[#allocation3 + $0x10] sm:$0x1] %vm89_vm6, %v5894_v3 }
  0x1e   :  { %92 = vst.msk [vmem:[#allocation3 + $0x20] sm:$0x1] %vm89_vm6, %v5894_v3  ;;  %93 = vst.msk [vmem:[#allocation3 + $0x30] sm:$0x1] %vm89_vm6, %v5894_v3 }
  0x1f   :  { %94 = vst.msk [vmem:[#allocation3 + $0x40] sm:$0x1] %vm89_vm6, %v5894_v3  ;;  %95 = vst.msk [vmem:[#allocation3 + $0x50] sm:$0x1] %vm89_vm6, %v5894_v3 }
  0x20   :  { %208 = vrot.lane.b32.xlu0 %v6191_v50, %s5895_s17  ;;  %96 = vst.msk [vmem:[#allocation3 + $0x60] sm:$0x1] %vm89_vm6, %v5894_v3  ;;  %97 = vst.msk [vmem:[#allocation3 + $0x70] sm:$0x1] %vm89_vm6, %v5894_v3 }
  0x21   :  { %224 = vrot.lane.b32.xlu1 %v6195_v51, %s5895_s17  ;;  %98 = vst.msk [vmem:[#allocation3 + $0x80] sm:$0x1] %vm89_vm6, %v5894_v3  ;;  %99 = vst.msk [vmem:[#allocation3 + $0x90] sm:$0x1] %vm89_vm6, %v5894_v3 }
  0x22   :  { %100 = vst.msk [vmem:[#allocation3 + $0xa0] sm:$0x1] %vm89_vm6, %v5894_v3  ;;  %101 = vst.msk [vmem:[#allocation3 + $0xb0] sm:$0x1] %vm89_vm6, %v5894_v3 }
  0x23   :  { %102 = vst.msk [vmem:[#allocation3 + $0xc0] sm:$0x1] %vm89_vm6, %v5894_v3  ;;  %103 = vst.msk [vmem:[#allocation3 + $0xd0] sm:$0x1] %vm89_vm6, %v5894_v3 }
  0x24   :  { %104 = vst.msk [vmem:[#allocation3 + $0xe0] sm:$0x1] %vm89_vm6, %v5894_v3  ;;  %105 = vst.msk [vmem:[#allocation3 + $0xf0] sm:$0x1] %vm89_vm6, %v5894_v3 }
  0x25   :  { %106 = vst.msk [vmem:[#allocation3 + $0x100] sm:$0x1] %vm89_vm6, %v5894_v3  ;;  %107 = vst.msk [vmem:[#allocation3 + $0x110] sm:$0x1] %vm89_vm6, %v5894_v3 }
  0x26   :  { %108 = vst.msk [vmem:[#allocation3 + $0x120] sm:$0x1] %vm89_vm6, %v5894_v3  ;;  %109 = vst.msk [vmem:[#allocation3 + $0x130] sm:$0x1] %vm89_vm6, %v5894_v3 }
  0x27   :  { %111 = vst.msk [vmem:[#allocation3 + $0x19] sm:$0x1] %vm89_vm6, %v5894_v3  ;;  %112 = vst.msk [vmem:[#allocation3 + $0x29] sm:$0x1] %vm89_vm6, %v5894_v3 }
  0x28   :  { %113 = vst.msk [vmem:[#allocation3 + $0x39] sm:$0x1] %vm89_vm6, %v5894_v3  ;;  %114 = vst.msk [vmem:[#allocation3 + $0x49] sm:$0x1] %vm89_vm6, %v5894_v3 }
  0x29   :  { %115 = vst.msk [vmem:[#allocation3 + $0x59] sm:$0x1] %vm89_vm6, %v5894_v3  ;;  %116 = vst.msk [vmem:[#allocation3 + $0x69] sm:$0x1] %vm89_vm6, %v5894_v3 }
  0x2a   :  { %117 = vst.msk [vmem:[#allocation3 + $0x79] sm:$0x1] %vm89_vm6, %v5894_v3  ;;  %118 = vst.msk [vmem:[#allocation3 + $0x89] sm:$0x1] %vm89_vm6, %v5894_v3 }
  0x2b   :  { %121 = vst.msk [vmem:[#allocation3 + $0xb9] sm:$0x1] %vm89_vm6, %v5894_v3  ;;  %122 = vst.msk [vmem:[#allocation3 + $0xc9] sm:$0x1] %vm89_vm6, %v5894_v3 }
  0x2c   :  { %123 = vst.msk [vmem:[#allocation3 + $0xd9] sm:$0x1] %vm89_vm6, %v5894_v3  ;;  %124 = vst.msk [vmem:[#allocation3 + $0xe9] sm:$0x1] %vm89_vm6, %v5894_v3 }
  0x2d   :  { %125 = vst.msk [vmem:[#allocation3 + $0xf9] sm:$0x1] %vm89_vm6, %v5894_v3  ;;  %126 = vst.msk [vmem:[#allocation3 + $0x109] sm:$0x1] %vm89_vm6, %v5894_v3 }
  0x2e   :  { %127 = vst.msk [vmem:[#allocation3 + $0x119] sm:$0x1] %vm89_vm6, %v5894_v3  ;;  %128 = vst.msk [vmem:[#allocation3 + $0x129] sm:$0x1] %vm89_vm6, %v5894_v3 }
  0x2f   :  { %110 = vst.msk [vmem:[#allocation3 + $0x9] sm:$0x1] %vm89_vm6, %v5894_v3  ;;  %119 = vst.msk [vmem:[#allocation3 + $0x99] sm:$0x1] %vm89_vm6, %v5894_v3 }
  0x30   :  { %120 = vst.msk [vmem:[#allocation3 + $0xa9] sm:$0x1] %vm89_vm6, %v5894_v3  ;;  %129 = vst.msk [vmem:[#allocation3 + $0x139] sm:$0x1] %vm89_vm6, %v5894_v3 }
  0x76   :  { %v195_v52 = vpop.permute.xlu0 %194 }
  0x77   :  { %v242_v53 = vmax.f32 %v5957_v4, %v195_v52  ;;  %v199_v54 = vpop.permute.xlu1 %198 }
  0x78   :  { %v244_v55 = vmax.f32 %v6048_v8, %v199_v54 }
  0x79   :  { %259 = vst.msk [vmem:[#allocation2 + $0x11] sm:$0xff] %vm26_vm0, %v242_v53  ;;  %v704_v53 = vld [vmem:[#allocation2 + $0x2] sm:$0xff] }
  0x7a   :  { %261 = vst.msk [vmem:[#allocation2 + $0x31] sm:$0xff] %vm26_vm0, %v244_v55  ;;  %v197_v56 = vpop.permute.xlu0 %196 }
  0x7b   :  { %v243_v57 = vmax.f32 %v6058_v11, %v197_v56  ;;  %v201_v58 = vpop.permute.xlu1 %200  ;;  %v4615_v56 = vld [vmem:[%s7207_s1 + $0x10] sm:$0xf] }
  0x7c   :  { %v245_v59 = vmax.f32 %v6062_v12, %v201_v58 }
  0x7d   :  { %260 = vst.msk [vmem:[#allocation2 + $0x21] sm:$0xff] %vm26_vm0, %v243_v57 }
  0x7e   :  { %262 = vst.msk [vmem:[#allocation2 + $0x41] sm:$0xff] %vm26_vm0, %v245_v59  ;;  %v203_v60 = vpop.permute.xlu0 %202 }
  0x7f   :  { %v246_v61 = vmax.f32 %v6078_v17, %v203_v60  ;;  %v205_v62 = vpop.permute.xlu1 %204 }
  0x80   :  { %v6210_v63 = vld [vmem:[#allocation2 + $0x11] sm:$0xff]  ;;  %v247_v0 = vmax.f32 %v6082_v18, %v205_v62  ;;  %v712_v62 = vld [vmem:[#allocation2 + $0xa2] sm:$0xff] }
  0x81   :  { %263 = vst.msk [vmem:[#allocation2 + $0x51] sm:$0xff] %vm26_vm0, %v246_v61  ;;  %5171 = vmatmul.mubr.msk.f32.vlgmr.msra.gmra.mrb[0].mxu0 %vm26_vm0, %v6210_v63  ;;  %v6225_v5 = vld [vmem:[#allocation2 + $0x31] sm:$0xff] }
  0x82   :  { %264 = vst.msk [vmem:[#allocation2 + $0x61] sm:$0xff] %vm26_vm0, %v247_v0  ;;  %5195 = vmatpush3.msk.msra.mxu0 %vm359_vm3, %v6102_v25  ;;  %v207_v2 = vpop.permute.xlu0 %206  ;;  %v6314_v41 = vld [vmem:[#allocation2 + $0x30] sm:$0xff] }
  0x83   :  { %v248_v4 = vmax.f32 %v6106_v26, %v207_v2  ;;  %v211_v6 = vpop.permute.xlu1 %210  ;;  %5220 = vmatprep.subr.msk.mxu0 %vm359_vm3, %v6216_v1  ;;  %v6361_v55 = vld [vmem:[#allocation2 + $0x12] sm:$0xff] }
  0x84   :  { %v6229_v7 = vld [vmem:[#allocation2 + $0x21] sm:$0xff]  ;;  %v250_v8 = vmax.f32 %v6111_v27, %v211_v6  ;;  %v6374_v58 = vld [vmem:[#allocation2 + $0x32] sm:$0xff] }
  0x85   :  { %265 = vst.msk [vmem:[#allocation2 + $0x71] sm:$0xff] %vm26_vm0, %v248_v4  ;;  %5173 = vmatprep.mubr.msk.f32.mxu0 %vm26_vm0, %v6229_v7  ;;  %v6235_v9 = vld [vmem:[#allocation2 + $0x41] sm:$0xff] }
  0x86   :  { %5174 = vmatmul.mubr.msk.f32.gmra.mrb[2].mxu0 %vm26_vm0, %v6225_v5  ;;  %267 = vst.msk [vmem:[#allocation2 + $0xb1] sm:$0xff] %vm26_vm0, %v250_v8  ;;  %v213_v10 = vpop.permute.xlu0 %212  ;;  %v6307_v40 = vld [vmem:[#allocation2 + $0x20] sm:$0xff] }
  0x87   :  { %5176 = vmatprep.mubr.msk.f32.mxu0 %vm26_vm0, %v6235_v9  ;;  %v251_v11 = vmax.f32 %v6131_v32, %v213_v10  ;;  %v215_v12 = vpop.permute.xlu1 %214  ;;  %v6318_v42 = vld [vmem:[#allocation2 + $0x40] sm:$0xff] }
  0x88   :  { %v6243_v13 = vld [vmem:[#allocation2 + $0x51] sm:$0xff]  ;;  %v252_v14 = vmax.f32 %v6135_v33, %v215_v12  ;;  %v6368_v57 = vld [vmem:[#allocation2 + $0x22] sm:$0xff] }
  0x89   :  { %268 = vst.msk [vmem:[#allocation2 + $0xc1] sm:$0xff] %vm26_vm0, %v251_v11  ;;  %v6247_v15 = vld [vmem:[#allocation2 + $0x61] sm:$0xff]  ;;  %v6322_v43 = vld [vmem:[#allocation2 + $0x50] sm:$0xff] }
  0x8a   :  { %5177 = vmatmul.mubr.msk.f32.gmra.mrb[4].mxu0 %vm26_vm0, %v6243_v13  ;;  %269 = vst.msk [vmem:[#allocation2 + $0xd1] sm:$0xff] %vm26_vm0, %v252_v14  ;;  %v217_v16 = vpop.permute.xlu0 %216  ;;  %v6378_v59 = vld [vmem:[#allocation2 + $0x42] sm:$0xff]  ;;  %v6382_v60 = vld [vmem:[#allocation2 + $0x52] sm:$0xff] }
  0x8b   :  { %5179 = vmatprep.mubr.msk.f32.mxu0 %vm26_vm0, %v6247_v15  ;;  %v253_v17 = vmax.f32 %v6151_v38, %v217_v16  ;;  %v219_v18 = vpop.permute.xlu1 %218  ;;  %v6300_v38 = vld [vmem:[#allocation2 + $0x10] sm:$0xff]  ;;  %v6386_v61 = vld [vmem:[#allocation2 + $0x62] sm:$0xff] }
  0x8c   :  { %v6255_v19 = vld [vmem:[#allocation2 + $0x71] sm:$0xff]  ;;  %v254_v20 = vmax.f32 %v6155_v39, %v219_v18  ;;  %v4597_v39 = vld [vmem:[%s7207_s1 + $0xc] sm:$0xf] }
  0x8d   :  { %270 = vst.msk [vmem:[#allocation2 + $0xe1] sm:$0xff] %vm26_vm0, %v253_v17  ;;  %v6263_v23 = vld [vmem:[#allocation2 + $0xb1] sm:$0xff] }
  0x8e   :  { %5180 = vmatmul.mubr.msk.f32.gmra.mrb[6].mxu0 %vm26_vm0, %v6255_v19  ;;  %271 = vst.msk [vmem:[#allocation2 + $0xf1] sm:$0xff] %vm26_vm0, %v254_v20  ;;  %v221_v22 = vpop.permute.xlu0 %220  ;;  %v6330_v46 = vld [vmem:[#allocation2 + $0x70] sm:$0xff]  ;;  %v4651_v17 = vld [vmem:[%s7207_s1 + $0x18] sm:$0xf]  ;;  %v4669_v20 = vld [vmem:[%s7207_s1 + $0x1c] sm:$0xf] }
  0x8f   :  { %5182 = vmatprep.mubr.msk.f32.mxu0 %vm26_vm0, %v301_v21  ;;  %v255_v24 = vmax.f32 %v6171_v44, %v221_v22  ;;  %v223_v25 = vpop.permute.xlu1 %222  ;;  %v6326_v44 = vld [vmem:[#allocation2 + $0x60] sm:$0xff]  ;;  %v285_v47 = vld [vmem:[#allocation2 + $0xb0] sm:$0xff] }
  0x90   :  { %v256_v26 = vmax.f32 %v6175_v45, %v223_v25  ;;  %v6267_v27 = vld [vmem:[#allocation2 + $0xc1] sm:$0xff]  ;;  %v6390_v0 = vld [vmem:[#allocation2 + $0x72] sm:$0xff] }
  0x91   :  { %272 = vst.msk [vmem:[#allocation2 + $0x101] sm:$0xff] %vm26_vm0, %v255_v24  ;;  %v6275_v29 = vld [vmem:[#allocation2 + $0xd1] sm:$0xff]  ;;  %v284_v45 = vld [vmem:[#allocation2 + $0xa0] sm:$0xff] }
  0x92   :  { %5183 = vmatmul.mubr.msk.f32.gmra.mrb[8].mxu0 %vm26_vm0, %v6263_v23  ;;  %273 = vst.msk [vmem:[#allocation2 + $0x111] sm:$0xff] %vm26_vm0, %v256_v26  ;;  %v209_v28 = vpop.permute.xlu0 %208  ;;  %v6336_v48 = vld [vmem:[#allocation2 + $0xc0] sm:$0xff]  ;;  %v6340_v49 = vld [vmem:[#allocation2 + $0xd0] sm:$0xff] }
  0x93   :  { %5185 = vmatprep.mubr.msk.f32.mxu0 %vm26_vm0, %v6267_v27  ;;  %v249_v30 = vmax.f32 %v6191_v50, %v209_v28  ;;  %v225_v31 = vpop.permute.xlu1 %224  ;;  %v6399_v2 = vld [vmem:[#allocation2 + $0xc2] sm:$0xff]  ;;  %v6403_v4 = vld [vmem:[#allocation2 + $0xd2] sm:$0xff]  ;;  %v6740_v28 = vld [vmem:[%s7210_s3] ss:$0 sm:$0xff] }
  0x94   :  { %v6278_v32 = vld [vmem:[#allocation2 + $0xe1] sm:$0xff]  ;;  %v257_v33 = vmax.f32 %v6195_v51, %v225_v31  ;;  %v4633_v12 = vld [vmem:[%s7207_s1 + $0x14] sm:$0xf] }
  0x95   :  { %266 = vst.msk [vmem:[#allocation2 + $0x81] sm:$0xff] %vm26_vm0, %v249_v30  ;;  %v6287_v34 = vld [vmem:[#allocation2 + $0xf1] sm:$0xff]  ;;  %v6344_v50 = vld [vmem:[#allocation2 + $0xe0] sm:$0xff] }
  0x96   :  { %5186 = vmatmul.mubr.msk.f32.gmra.mrb[10].mxu0 %vm26_vm0, %v6275_v29  ;;  %274 = vst.msk [vmem:[#allocation2 + $0x121] sm:$0xff] %vm26_vm0, %v257_v33  ;;  %v6348_v51 = vld [vmem:[#allocation2 + $0xf0] sm:$0xff]  ;;  %v6407_v6 = vld [vmem:[#allocation2 + $0xe2] sm:$0xff] }
  0x97   :  { %5188 = vmatprep.mubr.msk.f32.mxu0 %vm26_vm0, %v6278_v32  ;;  %v6411_v8 = vld [vmem:[#allocation2 + $0xf2] sm:$0xff]  ;;  %v2414_v26 = vld [vmem:[%s7208_s4] sm:$0xff] }
  0x98   :  { %v6289_v35 = vld [vmem:[#allocation2 + $0x101] sm:$0xff]  ;;  %v1633_v24 = vld [vmem:[#allocation2 + $0x90] sm:$0xff] }
  0x99   :  { %v6295_v36 = vld [vmem:[#allocation2 + $0x111] sm:$0xff]  ;;  %v6352_v52 = vld [vmem:[#allocation2 + $0x100] sm:$0xff] }
  0x9a   :  { %5189 = vmatmul.mubr.msk.f32.gmra.mrb[12].mxu0 %vm26_vm0, %v6287_v34  ;;  %v6356_v54 = vld [vmem:[#allocation2 + $0x110] sm:$0xff]  ;;  %v6415_v10 = vld [vmem:[#allocation2 + $0x102] sm:$0xff] }
  0x9b   :  { %5191 = vmatprep.mubr.msk.f32.mxu0 %vm26_vm0, %v6289_v35  ;;  %v6419_v11 = vld [vmem:[#allocation2 + $0x112] sm:$0xff] }
  0x9c   :  { %v6442_v14 = vld [vmem:[#allocation2 + $0x80] sm:$0xff]  ;;  %v1642_v25 = vld [vmem:[#allocation2 + $0x130] sm:$0xff] }
  0x9d   :  { %v6459_v16 = vld [vmem:[#allocation2 + $0x120] sm:$0xff] }
  0x9e   :  { %5192 = vmatmul.mubr.msk.f32.gmra.mrb[14].mxu0 %vm26_vm0, %v6295_v36  ;;  %v6500_v18 = vld [vmem:[#allocation2 + $0x121] sm:$0xff] }
  0x9f   :  { %5196 = vmatprep.mubr.msk.f32.mxu0 %vm26_vm0, %v275_v37  ;;  %v1402_v21 = vld [vmem:[#allocation2 + $0x82] sm:$0xff] }
  0xa0   :  { %v1410_v22 = vld [vmem:[#allocation2 + $0x122] sm:$0xff] }
  0xa2   :  { %5197 = vmatmul.mubr.msk.f32.vlgmr.msra.gmra.mrb[0].mxu0 %vm26_vm0, %v6300_v38 }
  0xa3   :  { %5221 = vmatpush3.msk.msra.mxu0 %vm359_vm3, %v6216_v1  ;;  %5199 = vmatprep.mubr.msk.f32.mxu0 %vm26_vm0, %v6307_v40  ;;  %v6395_v1 = vld [vmem:[#allocation2 + $0xb2] sm:$0xff] }
  0xa4   :  { %5246 = vmatprep.subr.msk.mxu0 %vm359_vm3, %v4597_v39 }
  0xa6   :  { %5200 = vmatmul.mubr.msk.f32.gmra.mrb[2].mxu0 %vm26_vm0, %v6314_v41 }
  0xa7   :  { %5202 = vmatprep.mubr.msk.f32.mxu0 %vm26_vm0, %v6318_v42 }
  0xaa   :  { %5203 = vmatmul.mubr.msk.f32.gmra.mrb[4].mxu0 %vm26_vm0, %v6322_v43 }
  0xab   :  { %5205 = vmatprep.mubr.msk.f32.mxu0 %vm26_vm0, %v6326_v44 }
  0xae   :  { %5206 = vmatmul.mubr.msk.f32.gmra.mrb[6].mxu0 %vm26_vm0, %v6330_v46 }
  0xaf   :  { %5208 = vmatprep.mubr.msk.f32.mxu0 %vm26_vm0, %v284_v45 }
  0xb2   :  { %5209 = vmatmul.mubr.msk.f32.gmra.mrb[8].mxu0 %vm26_vm0, %v285_v47 }
  0xb3   :  { %5211 = vmatprep.mubr.msk.f32.mxu0 %vm26_vm0, %v6336_v48 }
  0xb6   :  { %5212 = vmatmul.mubr.msk.f32.gmra.mrb[10].mxu0 %vm26_vm0, %v6340_v49 }
  0xb7   :  { %5214 = vmatprep.mubr.msk.f32.mxu0 %vm26_vm0, %v6344_v50 }
  0xba   :  { %5215 = vmatmul.mubr.msk.f32.gmra.mrb[12].mxu0 %vm26_vm0, %v6348_v51 }
  0xbb   :  { %5217 = vmatprep.mubr.msk.f32.mxu0 %vm26_vm0, %v6352_v52 }
  0xbe   :  { %5218 = vmatmul.mubr.msk.f32.gmra.mrb[14].mxu0 %vm26_vm0, %v6356_v54 }
  0xbf   :  { %5222 = vmatprep.mubr.msk.f32.mxu0 %vm26_vm0, %v704_v53 }
  0xc2   :  { %5223 = vmatmul.mubr.msk.f32.vlgmr.msra.gmra.mrb[0].mxu0 %vm26_vm0, %v6361_v55 }
  0xc3   :  { %5247 = vmatpush3.msk.msra.mxu0 %vm359_vm3, %v4597_v39  ;;  %5225 = vmatprep.mubr.msk.f32.mxu0 %vm26_vm0, %v6368_v57 }
  0xc4   :  { %5272 = vmatprep.subr.msk.mxu0 %vm359_vm3, %v4615_v56 }
  0xc6   :  { %5226 = vmatmul.mubr.msk.f32.gmra.mrb[2].mxu0 %vm26_vm0, %v6374_v58 }
  0xc7   :  { %5228 = vmatprep.mubr.msk.f32.mxu0 %vm26_vm0, %v6378_v59 }
  0xca   :  { %5229 = vmatmul.mubr.msk.f32.gmra.mrb[4].mxu0 %vm26_vm0, %v6382_v60 }
  0xcb   :  { %5231 = vmatprep.mubr.msk.f32.mxu0 %vm26_vm0, %v6386_v61 }
  0xce   :  { %5232 = vmatmul.mubr.msk.f32.gmra.mrb[6].mxu0 %vm26_vm0, %v6390_v0 }
  0xcf   :  { %5234 = vmatprep.mubr.msk.f32.mxu0 %vm26_vm0, %v712_v62 }
  0xd2   :  { %5235 = vmatmul.mubr.msk.f32.gmra.mrb[8].mxu0 %vm26_vm0, %v6395_v1 }
  0xd3   :  { %5237 = vmatprep.mubr.msk.f32.mxu0 %vm26_vm0, %v6399_v2 }
  0xd6   :  { %5238 = vmatmul.mubr.msk.f32.gmra.mrb[10].mxu0 %vm26_vm0, %v6403_v4 }
  0xd7   :  { %5240 = vmatprep.mubr.msk.f32.mxu0 %vm26_vm0, %v6407_v6 }
  0xda   :  { %5241 = vmatmul.mubr.msk.f32.gmra.mrb[12].mxu0 %vm26_vm0, %v6411_v8 }
  0xdb   :  { %5243 = vmatprep.mubr.msk.f32.mxu0 %vm26_vm0, %v6415_v10 }
  0xde   :  { %5244 = vmatmul.mubr.msk.f32.gmra.mrb[14].mxu0 %vm26_vm0, %v6419_v11 }
  0xdf   :  { %5248 = vmatprep.mubr.msk.f32.mxu0 %vm26_vm0, %v6300_v38 }
  0xe2   :  { %5249 = vmatmul.mubr.msk.f32.vlgmr.msra.gmra.mrb[0].mxu0 %vm26_vm0, %v6307_v40 }
  0xe3   :  { %5273 = vmatpush3.msk.msra.mxu0 %vm359_vm3, %v4615_v56  ;;  %5251 = vmatprep.mubr.msk.f32.mxu0 %vm26_vm0, %v6314_v41 }
  0xe4   :  { %5298 = vmatprep.subr.msk.mxu0 %vm359_vm3, %v4633_v12 }
  0xe6   :  { %5252 = vmatmul.mubr.msk.f32.gmra.mrb[2].mxu0 %vm26_vm0, %v6318_v42 }
  0xe7   :  { %5254 = vmatprep.mubr.msk.f32.mxu0 %vm26_vm0, %v6322_v43 }
  0xea   :  { %5255 = vmatmul.mubr.msk.f32.gmra.mrb[4].mxu0 %vm26_vm0, %v6326_v44 }
  0xeb   :  { %5257 = vmatprep.mubr.msk.f32.mxu0 %vm26_vm0, %v6330_v46 }
  0xee   :  { %5258 = vmatmul.mubr.msk.f32.gmra.mrb[6].mxu0 %vm26_vm0, %v6442_v14 }
  0xef   :  { %5260 = vmatprep.mubr.msk.f32.mxu0 %vm26_vm0, %v285_v47 }
  0xf2   :  { %5261 = vmatmul.mubr.msk.f32.gmra.mrb[8].mxu0 %vm26_vm0, %v6336_v48 }
  0xf3   :  { %5263 = vmatprep.mubr.msk.f32.mxu0 %vm26_vm0, %v6340_v49 }
  0xf6   :  { %5264 = vmatmul.mubr.msk.f32.gmra.mrb[10].mxu0 %vm26_vm0, %v6344_v50 }
  0xf7   :  { %5266 = vmatprep.mubr.msk.f32.mxu0 %vm26_vm0, %v6348_v51 }
  0xfa   :  { %5267 = vmatmul.mubr.msk.f32.gmra.mrb[12].mxu0 %vm26_vm0, %v6352_v52 }
  0xfb   :  { %5269 = vmatprep.mubr.msk.f32.mxu0 %vm26_vm0, %v6356_v54 }
  0xfe   :  { %5270 = vmatmul.mubr.msk.f32.gmra.mrb[14].mxu0 %vm26_vm0, %v6459_v16 }
  0xff   :  { %5274 = vmatprep.mubr.msk.f32.mxu0 %vm26_vm0, %v6210_v63  ;;  %v6482_v63 = vld [vmem:[#allocation2 + $0x81] sm:$0xff] }
 0x102   :  { %5275 = vmatmul.mubr.msk.f32.vlgmr.msra.gmra.mrb[0].mxu0 %vm26_vm0, %v6229_v7 }
 0x103   :  { %5299 = vmatpush3.msk.msra.mxu0 %vm359_vm3, %v4633_v12  ;;  %5277 = vmatprep.mubr.msk.f32.mxu0 %vm26_vm0, %v6225_v5 }
 0x104   :  { %5324 = vmatprep.subr.msk.mxu0 %vm359_vm3, %v4651_v17 }
 0x106   :  { %5278 = vmatmul.mubr.msk.f32.gmra.mrb[2].mxu0 %vm26_vm0, %v6235_v9 }
 0x107   :  { %5280 = vmatprep.mubr.msk.f32.mxu0 %vm26_vm0, %v6243_v13 }
 0x10a   :  { %5281 = vmatmul.mubr.msk.f32.gmra.mrb[4].mxu0 %vm26_vm0, %v6247_v15 }
 0x10b   :  { %5283 = vmatprep.mubr.msk.f32.mxu0 %vm26_vm0, %v6255_v19 }
 0x10e   :  { %5284 = vmatmul.mubr.msk.f32.gmra.mrb[6].mxu0 %vm26_vm0, %v6482_v63 }
 0x10f   :  { %5286 = vmatprep.mubr.msk.f32.mxu0 %vm26_vm0, %v6263_v23  ;;  %v4687_v23 = vld [vmem:[%s7207_s1 + $0x20] sm:$0xf] }
 0x112   :  { %5287 = vmatmul.mubr.msk.f32.gmra.mrb[8].mxu0 %vm26_vm0, %v6267_v27 }
 0x113   :  { %5289 = vmatprep.mubr.msk.f32.mxu0 %vm26_vm0, %v6275_v29 }
 0x116   :  { %5290 = vmatmul.mubr.msk.f32.gmra.mrb[10].mxu0 %vm26_vm0, %v6278_v32 }
 0x117   :  { %5292 = vmatprep.mubr.msk.f32.mxu0 %vm26_vm0, %v6287_v34 }
 0x11a   :  { %5293 = vmatmul.mubr.msk.f32.gmra.mrb[12].mxu0 %vm26_vm0, %v6289_v35 }
 0x11b   :  { %5295 = vmatprep.mubr.msk.f32.mxu0 %vm26_vm0, %v6295_v36 }
 0x11e   :  { %5296 = vmatmul.mubr.msk.f32.gmra.mrb[14].mxu0 %vm26_vm0, %v6500_v18 }
 0x11f   :  { %5300 = vmatprep.mubr.msk.f32.mxu0 %vm26_vm0, %v6361_v55 }
 0x122   :  { %5301 = vmatmul.mubr.msk.f32.vlgmr.msra.gmra.mrb[0].mxu0 %vm26_vm0, %v6368_v57 }
 0x123   :  { %5325 = vmatpush3.msk.msra.mxu0 %vm359_vm3, %v4651_v17  ;;  %5303 = vmatprep.mubr.msk.f32.mxu0 %vm26_vm0, %v6374_v58 }
 0x124   :  { %5350 = vmatprep.subr.msk.mxu0 %vm359_vm3, %v4669_v20 }
 0x126   :  { %5304 = vmatmul.mubr.msk.f32.gmra.mrb[2].mxu0 %vm26_vm0, %v6378_v59 }
 0x127   :  { %5306 = vmatprep.mubr.msk.f32.mxu0 %vm26_vm0, %v6382_v60 }
 0x12a   :  { %5307 = vmatmul.mubr.msk.f32.gmra.mrb[4].mxu0 %vm26_vm0, %v6386_v61 }
 0x12b   :  { %5309 = vmatprep.mubr.msk.f32.mxu0 %vm26_vm0, %v6390_v0 }
 0x12e   :  { %5310 = vmatmul.mubr.msk.f32.gmra.mrb[6].mxu0 %vm26_vm0, %v1402_v21 }
 0x12f   :  { %5312 = vmatprep.mubr.msk.f32.mxu0 %vm26_vm0, %v6395_v1 }
 0x132   :  { %5313 = vmatmul.mubr.msk.f32.gmra.mrb[8].mxu0 %vm26_vm0, %v6399_v2 }
 0x133   :  { %5315 = vmatprep.mubr.msk.f32.mxu0 %vm26_vm0, %v6403_v4 }
 0x136   :  { %5316 = vmatmul.mubr.msk.f32.gmra.mrb[10].mxu0 %vm26_vm0, %v6407_v6 }
 0x137   :  { %5318 = vmatprep.mubr.msk.f32.mxu0 %vm26_vm0, %v6411_v8 }
 0x13a   :  { %5319 = vmatmul.mubr.msk.f32.gmra.mrb[12].mxu0 %vm26_vm0, %v6415_v10 }
 0x13b   :  { %5321 = vmatprep.mubr.msk.f32.mxu0 %vm26_vm0, %v6419_v11 }
 0x13e   :  { %5322 = vmatmul.mubr.msk.f32.gmra.mrb[14].mxu0 %vm26_vm0, %v1410_v22 }
 0x13f   :  { %5326 = vmatprep.mubr.msk.f32.mxu0 %vm26_vm0, %v6307_v40 }
 0x142   :  { %5327 = vmatmul.mubr.msk.f32.vlgmr.msra.gmra.mrb[0].mxu0 %vm26_vm0, %v6314_v41 }
 0x143   :  { %5351 = vmatpush3.msk.msra.mxu0 %vm359_vm3, %v4669_v20  ;;  %5329 = vmatprep.mubr.msk.f32.mxu0 %vm26_vm0, %v6318_v42 }
 0x144   :  { %5376 = vmatprep.subr.msk.mxu0 %vm359_vm3, %v4687_v23 }
 0x146   :  { %5330 = vmatmul.mubr.msk.f32.gmra.mrb[2].mxu0 %vm26_vm0, %v6322_v43 }
 0x147   :  { %5332 = vmatprep.mubr.msk.f32.mxu0 %vm26_vm0, %v6326_v44 }
 0x14a   :  { %5333 = vmatmul.mubr.msk.f32.gmra.mrb[4].mxu0 %vm26_vm0, %v6330_v46 }
 0x14b   :  { %5335 = vmatprep.mubr.msk.f32.mxu0 %vm26_vm0, %v6442_v14 }
 0x14e   :  { %5336 = vmatmul.mubr.msk.f32.gmra.mrb[6].mxu0 %vm26_vm0, %v1633_v24 }
 0x14f   :  { %5338 = vmatprep.mubr.msk.f32.mxu0 %vm26_vm0, %v6336_v48 }
 0x152   :  { %5339 = vmatmul.mubr.msk.f32.gmra.mrb[8].mxu0 %vm26_vm0, %v6340_v49 }
 0x153   :  { %5341 = vmatprep.mubr.msk.f32.mxu0 %vm26_vm0, %v6344_v50 }
 0x156   :  { %5342 = vmatmul.mubr.msk.f32.gmra.mrb[10].mxu0 %vm26_vm0, %v6348_v51 }
 0x157   :  { %5344 = vmatprep.mubr.msk.f32.mxu0 %vm26_vm0, %v6352_v52 }
 0x15a   :  { %5345 = vmatmul.mubr.msk.f32.gmra.mrb[12].mxu0 %vm26_vm0, %v6356_v54 }
 0x15b   :  { %5347 = vmatprep.mubr.msk.f32.mxu0 %vm26_vm0, %v6459_v16 }
 0x15e   :  { %5348 = vmatmul.mubr.msk.f32.gmra.mrb[14].mxu0 %vm26_vm0, %v1642_v25 }
 0x15f   :  { %5352 = vmatprep.mubr.msk.f32.mxu0 %vm26_vm0, %v6229_v7  ;;  %v1864_v7 = vld [vmem:[#allocation2 + $0x91] sm:$0xff] }
 0x162   :  { %5353 = vmatmul.mubr.msk.f32.vlgmr.msra.gmra.mrb[0].mxu0 %vm26_vm0, %v6225_v5  ;;  %v1872_v5 = vld [vmem:[#allocation2 + $0x131] sm:$0xff] }
 0x163   :  { %5377 = vmatpush3.msk.msra.mxu0 %vm359_vm3, %v4687_v23  ;;  %5355 = vmatprep.mubr.msk.f32.mxu0 %vm26_vm0, %v6235_v9  ;;  %v2094_v9 = vld [vmem:[#allocation2 + $0x92] sm:$0xff] }
 0x166   :  { %5356 = vmatmul.mubr.msk.f32.gmra.mrb[2].mxu0 %vm26_vm0, %v6243_v13  ;;  %v2102_v13 = vld [vmem:[#allocation2 + $0x132] sm:$0xff] }
 0x167   :  { %5358 = vmatprep.mubr.msk.f32.mxu0 %vm26_vm0, %v6247_v15  ;;  %v4707_v15 = vld [vmem:[%s7208_s4 + $0x8] sm:$0xff] }
 0x168   :  { %5402 = vmatprep.subr.mxu1 %v4707_v15 }
 0x169   :  { %5403 = vmatpush3.msra.mxu1 %v4707_v15  ;;  %v2423_v15 = vld [vmem:[#allocation3 + $0xa1] sm:$0xff] }
 0x16a   :  { %5359 = vmatmul.mubr.msk.f32.gmra.mrb[4].mxu0 %vm26_vm0, %v6255_v19  ;;  %v2415_v19 = vld [vmem:[#allocation3 + $0x1] sm:$0xff]  ;;  %5428 = vmatprep.subr.mxu1 %v2414_v26 }
 0x16b   :  { %5361 = vmatprep.mubr.msk.f32.mxu0 %vm26_vm0, %v6482_v63  ;;  %5404 = vmatprep.mubr.msk.f32.mxu1 %vm78_vm4, %v2415_v19 }
 0x16e   :  { %5362 = vmatmul.mubr.msk.f32.gmra.mrb[6].mxu0 %vm26_vm0, %v1864_v7 }
 0x16f   :  { %5364 = vmatprep.mubr.msk.f32.mxu0 %vm26_vm0, %v6267_v27  ;;  %v6735_v27 = vld [vmem:[%s7209_s2] ss:$0 sm:$0xff] }
 0x172   :  { %5365 = vmatmul.mubr.msk.f32.gmra.mrb[8].mxu0 %vm26_vm0, %v6275_v29 }
 0x173   :  { %5367 = vmatprep.mubr.msk.f32.mxu0 %vm26_vm0, %v6278_v32 }
 0x176   :  { %5368 = vmatmul.mubr.msk.f32.gmra.mrb[10].mxu0 %vm26_vm0, %v6287_v34 }
 0x177   :  { %5370 = vmatprep.mubr.msk.f32.mxu0 %vm26_vm0, %v6289_v35 }
 0x17a   :  { %5371 = vmatmul.mubr.msk.f32.gmra.mrb[12].mxu0 %vm26_vm0, %v6295_v36 }
 0x17b   :  { %5373 = vmatprep.mubr.msk.f32.mxu0 %vm26_vm0, %v6500_v18 }
 0x17e   :  { %5374 = vmatmul.mubr.msk.f32.gmra.mrb[14].mxu0 %vm26_vm0, %v1872_v5 }
 0x17f   :  { %5378 = vmatprep.mubr.msk.f32.mxu0 %vm26_vm0, %v6368_v57 }
 0x182   :  { %5379 = vmatmul.mubr.msk.f32.vlgmr.msra.gmra.mrb[0].mxu0 %vm26_vm0, %v6374_v58  ;;  %v6767_v58 = vld [vmem:[%s7208_s4 + $0x10] sm:$0xff] }
 0x183   :  { %5381 = vmatprep.mubr.msk.f32.mxu0 %vm26_vm0, %v6378_v59 }
 0x186   :  { %5382 = vmatmul.mubr.msk.f32.gmra.mrb[2].mxu0 %vm26_vm0, %v6382_v60 }
 0x187   :  { %5384 = vmatprep.mubr.msk.f32.mxu0 %vm26_vm0, %v6386_v61 }
 0x18a   :  { %5385 = vmatmul.mubr.msk.f32.gmra.mrb[4].mxu0 %vm26_vm0, %v6390_v0 }
 0x18b   :  { %5387 = vmatprep.mubr.msk.f32.mxu0 %vm26_vm0, %v1402_v21 }
 0x18e   :  { %5388 = vmatmul.mubr.msk.f32.gmra.mrb[6].mxu0 %vm26_vm0, %v2094_v9 }
 0x18f   :  { %5390 = vmatprep.mubr.msk.f32.mxu0 %vm26_vm0, %v6399_v2 }
 0x192   :  { %5391 = vmatmul.mubr.msk.f32.gmra.mrb[8].mxu0 %vm26_vm0, %v6403_v4 }
 0x193   :  { %5393 = vmatprep.mubr.msk.f32.mxu0 %vm26_vm0, %v6407_v6 }
 0x196   :  { %5394 = vmatmul.mubr.msk.f32.gmra.mrb[10].mxu0 %vm26_vm0, %v6411_v8 }
 0x197   :  { %5396 = vmatprep.mubr.msk.f32.mxu0 %vm26_vm0, %v6415_v10 }
 0x19a   :  { %5397 = vmatmul.mubr.msk.f32.gmra.mrb[12].mxu0 %vm26_vm0, %v6419_v11 }
 0x19b   :  { %5399 = vmatprep.mubr.msk.f32.mxu0 %vm26_vm0, %v1410_v22 }
 0x19e   :  { %5400 = vmatmul.mubr.msk.f32.gmra.mrb[14].mxu0 %vm26_vm0, %v2102_v13 }
 0x255   :  { %v5380_v3 = vpop.f32.mrb[0].mxu0 }
 0x256   :  { %v2325_v29 = vmul.f32 %v5380_v3, %v6735_v27  ;;  %v2222_v30 = vpop.f32.mrb[1].mxu0 }
 0x257   :  { %v2324_v31 = vmul.f32 %v6735_v27, %v2222_v30 }
 0x258   :  { %v2348_v32 = vadd.f32 %v6740_v28, %v2325_v29 }
 0x259   :  { %v2347_v33 = vadd.f32 %v6740_v28, %v2324_v31  ;;  %v5383_v34 = vpop.f32.mrb[2].mxu0 }
 0x25a   :  { %v2364_v35 = vmax.f32 %v2348_v32, 0.0  ;;  %v2327_v36 = vmul.f32 %v5383_v34, %v6735_v27  ;;  %v2232_v37 = vpop.f32.mrb[3].mxu0 }
 0x25b   :  { %v2363_v38 = vmax.f32 %v2347_v33, 0.0  ;;  %v2326_v39 = vmul.f32 %v6735_v27, %v2232_v37 }
 0x25c   :  { %2381 = vst.msk [vmem:[#allocation3 + $0x21] sm:$0xff] %vm78_vm4, %v2364_v35  ;;  %v2350_v40 = vadd.f32 %v6740_v28, %v2327_v36 }
 0x25d   :  { %2380 = vst.msk [vmem:[#allocation3 + $0x11] sm:$0xff] %vm78_vm4, %v2363_v38  ;;  %v2349_v41 = vadd.f32 %v6740_v28, %v2326_v39  ;;  %v5386_v42 = vpop.f32.mrb[4].mxu0 }
 0x25e   :  { %v2366_v43 = vmax.f32 %v2350_v40, 0.0  ;;  %v2329_v44 = vmul.f32 %v5386_v42, %v6735_v27  ;;  %v2242_v45 = vpop.f32.mrb[5].mxu0 }
 0x25f   :  { %v2365_v46 = vmax.f32 %v2349_v41, 0.0  ;;  %v2328_v47 = vmul.f32 %v6735_v27, %v2242_v45 }
 0x260   :  { %2383 = vst.msk [vmem:[#allocation3 + $0x41] sm:$0xff] %vm78_vm4, %v2366_v43  ;;  %v2352_v48 = vadd.f32 %v6740_v28, %v2329_v44  ;;  %v2397_v43 = vld [vmem:[#allocation3] sm:$0xff] }
 0x261   :  { %2382 = vst.msk [vmem:[#allocation3 + $0x31] sm:$0xff] %vm78_vm4, %v2365_v46  ;;  %v2351_v49 = vadd.f32 %v6740_v28, %v2328_v47  ;;  %v5389_v50 = vpop.f32.mrb[6].mxu0  ;;  %v4757_v46 = vld [vmem:[%s7208_s4 + $0x18] sm:$0xff] }
 0x262   :  { %v2368_v51 = vmax.f32 %v2352_v48, 0.0  ;;  %v2331_v52 = vmul.f32 %v5389_v50, %v6735_v27  ;;  %v2252_v53 = vpop.f32.mrb[7].mxu0 }
 0x263   :  { %v2367_v54 = vmax.f32 %v2351_v49, 0.0  ;;  %v2330_v55 = vmul.f32 %v6735_v27, %v2252_v53  ;;  %v6773_v61 = vld [vmem:[#allocation3 + $0x21] sm:$0xff] }
 0x264   :  { %2385 = vst.msk [vmem:[#allocation3 + $0x61] sm:$0xff] %vm78_vm4, %v2368_v51  ;;  %v2354_v56 = vadd.f32 %v6740_v28, %v2331_v52  ;;  %v6762_v57 = vld [vmem:[#allocation3 + $0x11] sm:$0xff]  ;;  %v6861_v47 = vld [vmem:[#allocation3 + $0x20] sm:$0xff] }
 0x265   :  { %2384 = vst.msk [vmem:[#allocation3 + $0x51] sm:$0xff] %vm78_vm4, %v2367_v54  ;;  %v2353_v59 = vadd.f32 %v6740_v28, %v2330_v55  ;;  %v5392_v60 = vpop.f32.mrb[8].mxu0  ;;  %5405 = vmatmul.mubr.msk.f32.vlgmr.msra.gmra.mrb[0].mxu1 %vm78_vm4, %v6762_v57  ;;  %v6854_v45 = vld [vmem:[#allocation3 + $0x10] sm:$0xff]  ;;  %v2406_v52 = vld [vmem:[#allocation3 + $0xa0] sm:$0xff] }
 0x266   :  { %v2370_v62 = vmax.f32 %v2354_v56, 0.0  ;;  %v2333_v0 = vmul.f32 %v5392_v60, %v6735_v27  ;;  %5429 = vmatpush3.msra.mxu1 %v2414_v26  ;;  %v2262_v1 = vpop.f32.mrb[9].mxu0  ;;  %5407 = vmatprep.mubr.msk.f32.mxu1 %vm78_vm4, %v6773_v61 }
 0x267   :  { %v2369_v2 = vmax.f32 %v2353_v59, 0.0  ;;  %v2332_v4 = vmul.f32 %v6735_v27, %v2262_v1  ;;  %5454 = vmatprep.subr.mxu1 %v6767_v58  ;;  %v6788_v12 = vld [vmem:[#allocation3 + $0x41] sm:$0xff]  ;;  %v6913_v1 = vld [vmem:[#allocation3 + $0x12] sm:$0xff] }
 0x268   :  { %2387 = vst.msk [vmem:[#allocation3 + $0x81] sm:$0xff] %vm78_vm4, %v2370_v62  ;;  %v2356_v6 = vadd.f32 %v6740_v28, %v2333_v0  ;;  %v6782_v8 = vld [vmem:[#allocation3 + $0x31] sm:$0xff]  ;;  %v6870_v49 = vld [vmem:[#allocation3 + $0x40] sm:$0xff] }
 0x269   :  { %2386 = vst.msk [vmem:[#allocation3 + $0x71] sm:$0xff] %vm78_vm4, %v2369_v2  ;;  %v2355_v10 = vadd.f32 %v6740_v28, %v2332_v4  ;;  %v5395_v11 = vpop.f32.mrb[10].mxu0  ;;  %5408 = vmatmul.mubr.msk.f32.gmra.mrb[2].mxu1 %vm78_vm4, %v6782_v8  ;;  %v6866_v48 = vld [vmem:[#allocation3 + $0x30] sm:$0xff]  ;;  %v2819_v62 = vld [vmem:[#allocation3 + $0x2] sm:$0xff] }
 0x26a   :  { %v2372_v14 = vmax.f32 %v2356_v6, 0.0  ;;  %v2335_v16 = vmul.f32 %v5395_v11, %v6735_v27  ;;  %v2272_v17 = vpop.f32.mrb[11].mxu0  ;;  %5410 = vmatprep.mubr.msk.f32.mxu1 %vm78_vm4, %v6788_v12  ;;  %v4774_v2 = vld [vmem:[%s7208_s4 + $0x20] sm:$0xff]  ;;  %v6924_v6 = vld [vmem:[#allocation3 + $0x32] sm:$0xff] }
 0x26b   :  { %v2371_v63 = vmax.f32 %v2355_v10, 0.0  ;;  %v2334_v18 = vmul.f32 %v6735_v27, %v2272_v17  ;;  %v6802_v24 = vld [vmem:[#allocation3 + $0x61] sm:$0xff] }
 0x26c   :  { %2390 = vst.msk [vmem:[#allocation3 + $0xc1] sm:$0xff] %vm78_vm4, %v2372_v14  ;;  %v2358_v20 = vadd.f32 %v6740_v28, %v2335_v16  ;;  %v6796_v21 = vld [vmem:[#allocation3 + $0x51] sm:$0xff]  ;;  %v6878_v51 = vld [vmem:[#allocation3 + $0x60] sm:$0xff] }
 0x26d   :  { %2389 = vst.msk [vmem:[#allocation3 + $0xb1] sm:$0xff] %vm78_vm4, %v2371_v63  ;;  %v2357_v22 = vadd.f32 %v6740_v28, %v2334_v18  ;;  %v5398_v23 = vpop.f32.mrb[12].mxu0  ;;  %5411 = vmatmul.mubr.msk.f32.gmra.mrb[4].mxu1 %vm78_vm4, %v6796_v21  ;;  %v6874_v50 = vld [vmem:[#allocation3 + $0x50] sm:$0xff]  ;;  %v6920_v4 = vld [vmem:[#allocation3 + $0x22] sm:$0xff] }
 0x26e   :  { %v2374_v25 = vmax.f32 %v2358_v20, 0.0  ;;  %v2337_v7 = vmul.f32 %v5398_v23, %v6735_v27  ;;  %v2282_v5 = vpop.f32.mrb[13].mxu0  ;;  %5413 = vmatprep.mubr.msk.f32.mxu1 %vm78_vm4, %v6802_v24  ;;  %v6928_v10 = vld [vmem:[#allocation3 + $0x42] sm:$0xff]  ;;  %v6932_v11 = vld [vmem:[#allocation3 + $0x52] sm:$0xff] }
 0x26f   :  { %v2373_v9 = vmax.f32 %v2357_v22, 0.0  ;;  %v2336_v13 = vmul.f32 %v6735_v27, %v2282_v5  ;;  %v6936_v14 = vld [vmem:[#allocation3 + $0x62] sm:$0xff] }
 0x270   :  { %2392 = vst.msk [vmem:[#allocation3 + $0xe1] sm:$0xff] %vm78_vm4, %v2374_v25  ;;  %v2360_v19 = vadd.f32 %v6740_v28, %v2337_v7  ;;  %v6810_v26 = vld [vmem:[#allocation3 + $0x71] sm:$0xff]  ;;  %v2827_v16 = vld [vmem:[#allocation3 + $0xa2] sm:$0xff] }
 0x271   :  { %2391 = vst.msk [vmem:[#allocation3 + $0xd1] sm:$0xff] %vm78_vm4, %v2373_v9  ;;  %v2359_v3 = vadd.f32 %v6740_v28, %v2336_v13  ;;  %v5401_v29 = vpop.f32.mrb[14].mxu0  ;;  %5414 = vmatmul.mubr.msk.f32.gmra.mrb[6].mxu1 %vm78_vm4, %v6810_v26  ;;  %v6882_v53 = vld [vmem:[#allocation3 + $0x70] sm:$0xff]  ;;  %v4791_v5 = vld [vmem:[%s7208_s4 + $0x28] sm:$0xff]  ;;  %v3053_v9 = vld [vmem:[#allocation3 + $0x80] sm:$0xff] }
 0x272   :  { %v2376_v30 = vmax.f32 %v2360_v19, 0.0  ;;  %v2339_v31 = vmul.f32 %v5401_v29, %v6735_v27  ;;  %v2292_v32 = vpop.f32.mrb[15].mxu0  ;;  %5416 = vmatprep.mubr.msk.f32.mxu1 %vm78_vm4, %v2423_v15  ;;  %v6940_v17 = vld [vmem:[#allocation3 + $0x72] sm:$0xff]  ;;  %v3507_v29 = vld [vmem:[#allocation3 + $0x82] sm:$0xff] }
 0x273   :  { %v2375_v33 = vmax.f32 %v2359_v3, 0.0  ;;  %v2338_v34 = vmul.f32 %v6735_v27, %v2292_v32  ;;  %v6827_v38 = vld [vmem:[#allocation3 + $0xc1] sm:$0xff]  ;;  %v4808_v15 = vld [vmem:[%s7208_s4 + $0x30] sm:$0xff]  ;;  %v4825_v3 = vld [vmem:[%s7208_s4 + $0x38] sm:$0xff] }
 0x274   :  { %2394 = vst.msk [vmem:[#allocation3 + $0x101] sm:$0xff] %vm78_vm4, %v2376_v30  ;;  %v2362_v35 = vadd.f32 %v6740_v28, %v2339_v31  ;;  %v6821_v36 = vld [vmem:[#allocation3 + $0xb1] sm:$0xff]  ;;  %v6888_v55 = vld [vmem:[#allocation3 + $0xc0] sm:$0xff] }
 0x275   :  { %2393 = vst.msk [vmem:[#allocation3 + $0xf1] sm:$0xff] %vm78_vm4, %v2375_v33  ;;  %v2361_v37 = vadd.f32 %v6740_v28, %v2338_v34  ;;  %5417 = vmatmul.mubr.msk.f32.gmra.mrb[8].mxu1 %vm78_vm4, %v6821_v36  ;;  %v2407_v54 = vld [vmem:[#allocation3 + $0xb0] sm:$0xff]  ;;  %v6949_v18 = vld [vmem:[#allocation3 + $0xc2] sm:$0xff] }
 0x276   :  { %v2378_v39 = vmax.f32 %v2362_v35, 0.0  ;;  %5419 = vmatprep.mubr.msk.f32.mxu1 %vm78_vm4, %v6827_v38  ;;  %v6945_v63 = vld [vmem:[#allocation3 + $0xb2] sm:$0xff]  ;;  %v4842_v31 = vld [vmem:[%s7208_s4 + $0x40] sm:$0xff] }
 0x277   :  { %v2377_v27 = vmax.f32 %v2361_v37, 0.0  ;;  %v6837_v28 = vld [vmem:[#allocation3 + $0xe1] sm:$0xff]  ;;  %v3735_v32 = vld [vmem:[#allocation3 + $0x90] sm:$0xff] }
 0x278   :  { %2396 = vst.msk [vmem:[#allocation3 + $0x121] sm:$0xff] %vm78_vm4, %v2378_v39  ;;  %v6832_v40 = vld [vmem:[#allocation3 + $0xd1] sm:$0xff]  ;;  %v6957_v22 = vld [vmem:[#allocation3 + $0xe2] sm:$0xff] }
 0x279   :  { %2395 = vst.msk [vmem:[#allocation3 + $0x111] sm:$0xff] %vm78_vm4, %v2377_v27  ;;  %5420 = vmatmul.mubr.msk.f32.gmra.mrb[10].mxu1 %vm78_vm4, %v6832_v40  ;;  %v6892_v56 = vld [vmem:[#allocation3 + $0xd0] sm:$0xff] }
 0x27a   :  { %5422 = vmatprep.mubr.msk.f32.mxu1 %vm78_vm4, %v6837_v28  ;;  %v6953_v20 = vld [vmem:[#allocation3 + $0xd2] sm:$0xff] }
 0x27b   :  { %v6845_v42 = vld [vmem:[#allocation3 + $0x101] sm:$0xff]  ;;  %v3744_v33 = vld [vmem:[#allocation3 + $0x130] sm:$0xff] }
 0x27c   :  { %v6841_v41 = vld [vmem:[#allocation3 + $0xf1] sm:$0xff]  ;;  %v6904_v60 = vld [vmem:[#allocation3 + $0x100] sm:$0xff] }
 0x27d   :  { %5423 = vmatmul.mubr.msk.f32.gmra.mrb[12].mxu1 %vm78_vm4, %v6841_v41  ;;  %v6900_v59 = vld [vmem:[#allocation3 + $0xf0] sm:$0xff]  ;;  %v6965_v25 = vld [vmem:[#allocation3 + $0x102] sm:$0xff] }
 0x27e   :  { %5425 = vmatprep.mubr.msk.f32.mxu1 %vm78_vm4, %v6845_v42  ;;  %v6961_v23 = vld [vmem:[#allocation3 + $0xf2] sm:$0xff] }
 0x27f   :  { %v3061_v13 = vld [vmem:[#allocation3 + $0x120] sm:$0xff]  ;;  %v3963_v34 = vld [vmem:[#allocation3 + $0x91] sm:$0xff] }
 0x280   :  { %v6849_v44 = vld [vmem:[#allocation3 + $0x111] sm:$0xff]  ;;  %v3288_v19 = vld [vmem:[#allocation3 + $0x121] sm:$0xff] }
 0x281   :  { %5426 = vmatmul.mubr.msk.f32.gmra.mrb[14].mxu1 %vm78_vm4, %v6849_v44  ;;  %v6908_v0 = vld [vmem:[#allocation3 + $0x110] sm:$0xff]  ;;  %v3515_v30 = vld [vmem:[#allocation3 + $0x122] sm:$0xff] }
 0x282   :  { %5430 = vmatprep.mubr.msk.f32.mxu1 %vm78_vm4, %v2397_v43  ;;  %v6969_v7 = vld [vmem:[#allocation3 + $0x112] sm:$0xff] }
 0x285   :  { %5431 = vmatmul.mubr.msk.f32.vlgmr.msra.gmra.mrb[0].mxu1 %vm78_vm4, %v6854_v45 }
 0x286   :  { %5455 = vmatpush3.msra.mxu1 %v6767_v58  ;;  %5433 = vmatprep.mubr.msk.f32.mxu1 %vm78_vm4, %v6861_v47  ;;  %v6896_v58 = vld [vmem:[#allocation3 + $0xe0] sm:$0xff] }
 0x287   :  { %5480 = vmatprep.subr.mxu1 %v4757_v46 }
 0x289   :  { %5434 = vmatmul.mubr.msk.f32.gmra.mrb[2].mxu1 %vm78_vm4, %v6866_v48 }
 0x28a   :  { %5436 = vmatprep.mubr.msk.f32.mxu1 %vm78_vm4, %v6870_v49 }
 0x28d   :  { %5437 = vmatmul.mubr.msk.f32.gmra.mrb[4].mxu1 %vm78_vm4, %v6874_v50 }
 0x28e   :  { %5439 = vmatprep.mubr.msk.f32.mxu1 %vm78_vm4, %v6878_v51 }
 0x291   :  { %5440 = vmatmul.mubr.msk.f32.gmra.mrb[6].mxu1 %vm78_vm4, %v6882_v53 }
 0x292   :  { %5442 = vmatprep.mubr.msk.f32.mxu1 %vm78_vm4, %v2406_v52 }
 0x295   :  { %5443 = vmatmul.mubr.msk.f32.gmra.mrb[8].mxu1 %vm78_vm4, %v2407_v54 }
 0x296   :  { %5445 = vmatprep.mubr.msk.f32.mxu1 %vm78_vm4, %v6888_v55 }
 0x299   :  { %5446 = vmatmul.mubr.msk.f32.gmra.mrb[10].mxu1 %vm78_vm4, %v6892_v56 }
 0x29a   :  { %5448 = vmatprep.mubr.msk.f32.mxu1 %vm78_vm4, %v6896_v58 }
 0x29d   :  { %5449 = vmatmul.mubr.msk.f32.gmra.mrb[12].mxu1 %vm78_vm4, %v6900_v59 }
 0x29e   :  { %5451 = vmatprep.mubr.msk.f32.mxu1 %vm78_vm4, %v6904_v60 }
 0x2a1   :  { %5452 = vmatmul.mubr.msk.f32.gmra.mrb[14].mxu1 %vm78_vm4, %v6908_v0 }
 0x2a2   :  { %5456 = vmatprep.mubr.msk.f32.mxu1 %vm78_vm4, %v2819_v62 }
 0x2a5   :  { %5457 = vmatmul.mubr.msk.f32.vlgmr.msra.gmra.mrb[0].mxu1 %vm78_vm4, %v6913_v1 }
 0x2a6   :  { %5481 = vmatpush3.msra.mxu1 %v4757_v46  ;;  %5459 = vmatprep.mubr.msk.f32.mxu1 %vm78_vm4, %v6920_v4 }
 0x2a7   :  { %5506 = vmatprep.subr.mxu1 %v4774_v2 }
 0x2a9   :  { %5460 = vmatmul.mubr.msk.f32.gmra.mrb[2].mxu1 %vm78_vm4, %v6924_v6 }
 0x2aa   :  { %5462 = vmatprep.mubr.msk.f32.mxu1 %vm78_vm4, %v6928_v10 }
 0x2ad   :  { %5463 = vmatmul.mubr.msk.f32.gmra.mrb[4].mxu1 %vm78_vm4, %v6932_v11 }
 0x2ae   :  { %5465 = vmatprep.mubr.msk.f32.mxu1 %vm78_vm4, %v6936_v14 }
 0x2b1   :  { %5466 = vmatmul.mubr.msk.f32.gmra.mrb[6].mxu1 %vm78_vm4, %v6940_v17 }
 0x2b2   :  { %5468 = vmatprep.mubr.msk.f32.mxu1 %vm78_vm4, %v2827_v16 }
 0x2b5   :  { %5469 = vmatmul.mubr.msk.f32.gmra.mrb[8].mxu1 %vm78_vm4, %v6945_v63 }
 0x2b6   :  { %5471 = vmatprep.mubr.msk.f32.mxu1 %vm78_vm4, %v6949_v18 }
 0x2b9   :  { %5472 = vmatmul.mubr.msk.f32.gmra.mrb[10].mxu1 %vm78_vm4, %v6953_v20 }
 0x2ba   :  { %5474 = vmatprep.mubr.msk.f32.mxu1 %vm78_vm4, %v6957_v22 }
 0x2bd   :  { %5475 = vmatmul.mubr.msk.f32.gmra.mrb[12].mxu1 %vm78_vm4, %v6961_v23 }
 0x2be   :  { %5477 = vmatprep.mubr.msk.f32.mxu1 %vm78_vm4, %v6965_v25 }
 0x2c1   :  { %5478 = vmatmul.mubr.msk.f32.gmra.mrb[14].mxu1 %vm78_vm4, %v6969_v7 }
 0x2c2   :  { %5482 = vmatprep.mubr.msk.f32.mxu1 %vm78_vm4, %v6854_v45 }
 0x2c5   :  { %5483 = vmatmul.mubr.msk.f32.vlgmr.msra.gmra.mrb[0].mxu1 %vm78_vm4, %v6861_v47 }
 0x2c6   :  { %5507 = vmatpush3.msra.mxu1 %v4774_v2  ;;  %5485 = vmatprep.mubr.msk.f32.mxu1 %vm78_vm4, %v6866_v48 }
 0x2c7   :  { %5532 = vmatprep.subr.mxu1 %v4791_v5 }
 0x2c9   :  { %5486 = vmatmul.mubr.msk.f32.gmra.mrb[2].mxu1 %vm78_vm4, %v6870_v49 }
 0x2ca   :  { %5488 = vmatprep.mubr.msk.f32.mxu1 %vm78_vm4, %v6874_v50 }
 0x2cd   :  { %5489 = vmatmul.mubr.msk.f32.gmra.mrb[4].mxu1 %vm78_vm4, %v6878_v51 }
 0x2ce   :  { %5491 = vmatprep.mubr.msk.f32.mxu1 %vm78_vm4, %v6882_v53 }
 0x2d1   :  { %5492 = vmatmul.mubr.msk.f32.gmra.mrb[6].mxu1 %vm78_vm4, %v3053_v9 }
 0x2d2   :  { %5494 = vmatprep.mubr.msk.f32.mxu1 %vm78_vm4, %v2407_v54 }
 0x2d5   :  { %5495 = vmatmul.mubr.msk.f32.gmra.mrb[8].mxu1 %vm78_vm4, %v6888_v55 }
 0x2d6   :  { %5497 = vmatprep.mubr.msk.f32.mxu1 %vm78_vm4, %v6892_v56 }
 0x2d9   :  { %5498 = vmatmul.mubr.msk.f32.gmra.mrb[10].mxu1 %vm78_vm4, %v6896_v58 }
 0x2da   :  { %5500 = vmatprep.mubr.msk.f32.mxu1 %vm78_vm4, %v6900_v59 }
 0x2dd   :  { %5501 = vmatmul.mubr.msk.f32.gmra.mrb[12].mxu1 %vm78_vm4, %v6904_v60 }
 0x2de   :  { %5503 = vmatprep.mubr.msk.f32.mxu1 %vm78_vm4, %v6908_v0 }
 0x2e1   :  { %5504 = vmatmul.mubr.msk.f32.gmra.mrb[14].mxu1 %vm78_vm4, %v3061_v13 }
 0x2e2   :  { %5508 = vmatprep.mubr.msk.f32.mxu1 %vm78_vm4, %v6762_v57  ;;  %v3280_v57 = vld [vmem:[#allocation3 + $0x81] sm:$0xff] }
 0x2e5   :  { %5509 = vmatmul.mubr.msk.f32.vlgmr.msra.gmra.mrb[0].mxu1 %vm78_vm4, %v6773_v61 }
 0x2e6   :  { %5533 = vmatpush3.msra.mxu1 %v4791_v5  ;;  %5511 = vmatprep.mubr.msk.f32.mxu1 %vm78_vm4, %v6782_v8 }
 0x2e7   :  { %5558 = vmatprep.subr.mxu1 %v4808_v15 }
 0x2e9   :  { %5512 = vmatmul.mubr.msk.f32.gmra.mrb[2].mxu1 %vm78_vm4, %v6788_v12 }
 0x2ea   :  { %5514 = vmatprep.mubr.msk.f32.mxu1 %vm78_vm4, %v6796_v21 }
 0x2ed   :  { %5515 = vmatmul.mubr.msk.f32.gmra.mrb[4].mxu1 %vm78_vm4, %v6802_v24 }
 0x2ee   :  { %5517 = vmatprep.mubr.msk.f32.mxu1 %vm78_vm4, %v6810_v26 }
 0x2f1   :  { %5518 = vmatmul.mubr.msk.f32.gmra.mrb[6].mxu1 %vm78_vm4, %v3280_v57 }
 0x2f2   :  { %5520 = vmatprep.mubr.msk.f32.mxu1 %vm78_vm4, %v6821_v36 }
 0x2f5   :  { %5521 = vmatmul.mubr.msk.f32.gmra.mrb[8].mxu1 %vm78_vm4, %v6827_v38 }
 0x2f6   :  { %5523 = vmatprep.mubr.msk.f32.mxu1 %vm78_vm4, %v6832_v40 }
 0x2f9   :  { %5524 = vmatmul.mubr.msk.f32.gmra.mrb[10].mxu1 %vm78_vm4, %v6837_v28 }
 0x2fa   :  { %5526 = vmatprep.mubr.msk.f32.mxu1 %vm78_vm4, %v6841_v41 }
 0x2fd   :  { %5527 = vmatmul.mubr.msk.f32.gmra.mrb[12].mxu1 %vm78_vm4, %v6845_v42 }
 0x2fe   :  { %5529 = vmatprep.mubr.msk.f32.mxu1 %vm78_vm4, %v6849_v44 }
 0x301   :  { %5530 = vmatmul.mubr.msk.f32.gmra.mrb[14].mxu1 %vm78_vm4, %v3288_v19 }
 0x302   :  { %5534 = vmatprep.mubr.msk.f32.mxu1 %vm78_vm4, %v6913_v1 }
 0x305   :  { %5535 = vmatmul.mubr.msk.f32.vlgmr.msra.gmra.mrb[0].mxu1 %vm78_vm4, %v6920_v4 }
 0x306   :  { %5559 = vmatpush3.msra.mxu1 %v4808_v15  ;;  %5537 = vmatprep.mubr.msk.f32.mxu1 %vm78_vm4, %v6924_v6 }
 0x307   :  { %5584 = vmatprep.subr.mxu1 %v4825_v3 }
 0x309   :  { %5538 = vmatmul.mubr.msk.f32.gmra.mrb[2].mxu1 %vm78_vm4, %v6928_v10 }
 0x30a   :  { %5540 = vmatprep.mubr.msk.f32.mxu1 %vm78_vm4, %v6932_v11 }
 0x30d   :  { %5541 = vmatmul.mubr.msk.f32.gmra.mrb[4].mxu1 %vm78_vm4, %v6936_v14 }
 0x30e   :  { %5543 = vmatprep.mubr.msk.f32.mxu1 %vm78_vm4, %v6940_v17 }
 0x311   :  { %5544 = vmatmul.mubr.msk.f32.gmra.mrb[6].mxu1 %vm78_vm4, %v3507_v29 }
 0x312   :  { %5546 = vmatprep.mubr.msk.f32.mxu1 %vm78_vm4, %v6945_v63 }
 0x315   :  { %5547 = vmatmul.mubr.msk.f32.gmra.mrb[8].mxu1 %vm78_vm4, %v6949_v18 }
 0x316   :  { %5549 = vmatprep.mubr.msk.f32.mxu1 %vm78_vm4, %v6953_v20 }
 0x319   :  { %5550 = vmatmul.mubr.msk.f32.gmra.mrb[10].mxu1 %vm78_vm4, %v6957_v22 }
 0x31a   :  { %5552 = vmatprep.mubr.msk.f32.mxu1 %vm78_vm4, %v6961_v23 }
 0x31d   :  { %5553 = vmatmul.mubr.msk.f32.gmra.mrb[12].mxu1 %vm78_vm4, %v6965_v25 }
 0x31e   :  { %5555 = vmatprep.mubr.msk.f32.mxu1 %vm78_vm4, %v6969_v7 }
 0x321   :  { %5556 = vmatmul.mubr.msk.f32.gmra.mrb[14].mxu1 %vm78_vm4, %v3515_v30 }
 0x322   :  { %5560 = vmatprep.mubr.msk.f32.mxu1 %vm78_vm4, %v6861_v47 }
 0x325   :  { %5561 = vmatmul.mubr.msk.f32.vlgmr.msra.gmra.mrb[0].mxu1 %vm78_vm4, %v6866_v48 }
 0x326   :  { %5585 = vmatpush3.msra.mxu1 %v4825_v3  ;;  %5563 = vmatprep.mubr.msk.f32.mxu1 %vm78_vm4, %v6870_v49 }
 0x327   :  { %5610 = vmatprep.subr.mxu1 %v4842_v31 }
 0x329   :  { %5564 = vmatmul.mubr.msk.f32.gmra.mrb[2].mxu1 %vm78_vm4, %v6874_v50 }
 0x32a   :  { %5566 = vmatprep.mubr.msk.f32.mxu1 %vm78_vm4, %v6878_v51 }
 0x32d   :  { %5567 = vmatmul.mubr.msk.f32.gmra.mrb[4].mxu1 %vm78_vm4, %v6882_v53 }
 0x32e   :  { %5569 = vmatprep.mubr.msk.f32.mxu1 %vm78_vm4, %v3053_v9 }
 0x331   :  { %5570 = vmatmul.mubr.msk.f32.gmra.mrb[6].mxu1 %vm78_vm4, %v3735_v32 }
 0x332   :  { %5572 = vmatprep.mubr.msk.f32.mxu1 %vm78_vm4, %v6888_v55 }
 0x335   :  { %5573 = vmatmul.mubr.msk.f32.gmra.mrb[8].mxu1 %vm78_vm4, %v6892_v56 }
 0x336   :  { %5575 = vmatprep.mubr.msk.f32.mxu1 %vm78_vm4, %v6896_v58 }
 0x339   :  { %5576 = vmatmul.mubr.msk.f32.gmra.mrb[10].mxu1 %vm78_vm4, %v6900_v59 }
 0x33a   :  { %5578 = vmatprep.mubr.msk.f32.mxu1 %vm78_vm4, %v6904_v60 }
 0x33d   :  { %5579 = vmatmul.mubr.msk.f32.gmra.mrb[12].mxu1 %vm78_vm4, %v6908_v0 }
 0x33e   :  { %5581 = vmatprep.mubr.msk.f32.mxu1 %vm78_vm4, %v3061_v13 }
 0x341   :  { %5582 = vmatmul.mubr.msk.f32.gmra.mrb[14].mxu1 %vm78_vm4, %v3744_v33 }
 0x342   :  { %5586 = vmatprep.mubr.msk.f32.mxu1 %vm78_vm4, %v6773_v61  ;;  %v3971_v61 = vld [vmem:[#allocation3 + $0x131] sm:$0xff] }
 0x345   :  { %5587 = vmatmul.mubr.msk.f32.vlgmr.msra.gmra.mrb[0].mxu1 %vm78_vm4, %v6782_v8  ;;  %v4190_v8 = vld [vmem:[#allocation3 + $0x92] sm:$0xff] }
 0x346   :  { %5611 = vmatpush3.msra.mxu1 %v4842_v31  ;;  %5589 = vmatprep.mubr.msk.f32.mxu1 %vm78_vm4, %v6788_v12  ;;  %v4198_v12 = vld [vmem:[#allocation3 + $0x132] sm:$0xff] }
 0x349   :  { %5590 = vmatmul.mubr.msk.f32.gmra.mrb[2].mxu1 %vm78_vm4, %v6796_v21  ;;  %v7161_v21 = vld [vmem:[%s7211_s5] ss:$0 sm:$0xff] }
 0x34a   :  { %5592 = vmatprep.mubr.msk.f32.mxu1 %vm78_vm4, %v6802_v24 }
 0x34d   :  { %5593 = vmatmul.mubr.msk.f32.gmra.mrb[4].mxu1 %vm78_vm4, %v6810_v26  ;;  %v7166_v26 = vld [vmem:[%s7212_s6] ss:$0 sm:$0xff] }
 0x34e   :  { %5595 = vmatprep.mubr.msk.f32.mxu1 %vm78_vm4, %v3280_v57 }
 0x351   :  { %5596 = vmatmul.mubr.msk.f32.gmra.mrb[6].mxu1 %vm78_vm4, %v3963_v34 }
 0x352   :  { %5598 = vmatprep.mubr.msk.f32.mxu1 %vm78_vm4, %v6827_v38 }
 0x355   :  { %5599 = vmatmul.mubr.msk.f32.gmra.mrb[8].mxu1 %vm78_vm4, %v6832_v40 }
 0x356   :  { %5601 = vmatprep.mubr.msk.f32.mxu1 %vm78_vm4, %v6837_v28 }
 0x359   :  { %5602 = vmatmul.mubr.msk.f32.gmra.mrb[10].mxu1 %vm78_vm4, %v6841_v41 }
 0x35a   :  { %5604 = vmatprep.mubr.msk.f32.mxu1 %vm78_vm4, %v6845_v42 }
 0x35d   :  { %5605 = vmatmul.mubr.msk.f32.gmra.mrb[12].mxu1 %vm78_vm4, %v6849_v44 }
 0x35e   :  { %5607 = vmatprep.mubr.msk.f32.mxu1 %vm78_vm4, %v3288_v19 }
 0x361   :  { %5608 = vmatmul.mubr.msk.f32.gmra.mrb[14].mxu1 %vm78_vm4, %v3971_v61 }
 0x362   :  { %5612 = vmatprep.mubr.msk.f32.mxu1 %vm78_vm4, %v6920_v4 }
 0x365   :  { %5613 = vmatmul.mubr.msk.f32.vlgmr.msra.gmra.mrb[0].mxu1 %vm78_vm4, %v6924_v6 }
 0x366   :  { %5615 = vmatprep.mubr.msk.f32.mxu1 %vm78_vm4, %v6928_v10 }
 0x369   :  { %5616 = vmatmul.mubr.msk.f32.gmra.mrb[2].mxu1 %vm78_vm4, %v6932_v11 }
 0x36a   :  { %5618 = vmatprep.mubr.msk.f32.mxu1 %vm78_vm4, %v6936_v14 }
 0x36d   :  { %5619 = vmatmul.mubr.msk.f32.gmra.mrb[4].mxu1 %vm78_vm4, %v6940_v17 }
 0x36e   :  { %5621 = vmatprep.mubr.msk.f32.mxu1 %vm78_vm4, %v3507_v29 }
 0x371   :  { %5622 = vmatmul.mubr.msk.f32.gmra.mrb[6].mxu1 %vm78_vm4, %v4190_v8 }
 0x372   :  { %5624 = vmatprep.mubr.msk.f32.mxu1 %vm78_vm4, %v6949_v18 }
 0x375   :  { %5625 = vmatmul.mubr.msk.f32.gmra.mrb[8].mxu1 %vm78_vm4, %v6953_v20 }
 0x376   :  { %5627 = vmatprep.mubr.msk.f32.mxu1 %vm78_vm4, %v6957_v22 }
 0x379   :  { %5628 = vmatmul.mubr.msk.f32.gmra.mrb[10].mxu1 %vm78_vm4, %v6961_v23 }
 0x37a   :  { %5630 = vmatprep.mubr.msk.f32.mxu1 %vm78_vm4, %v6965_v25 }
 0x37d   :  { %5631 = vmatmul.mubr.msk.f32.gmra.mrb[12].mxu1 %vm78_vm4, %v6969_v7 }
 0x37e   :  { %5633 = vmatprep.mubr.msk.f32.mxu1 %vm78_vm4, %v3515_v30 }
 0x381   :  { %5634 = vmatmul.mubr.msk.f32.gmra.mrb[14].mxu1 %vm78_vm4, %v4198_v12 }
 0x438   :  { %v5614_v24 = vpop.f32.mrb[0].mxu1 }
 0x439   :  { %v4315_v35 = vpop.f32.mrb[1].mxu1  ;;  %v4418_v36 = vmul.f32 %v5614_v24, %v7161_v21 }
 0x43a   :  { %v4417_v37 = vmul.f32 %v7161_v21, %v4315_v35 }
 0x43b   :  { %v4441_v40 = vadd.f32 %v7166_v26, %v4418_v36 }
 0x43c   :  { %v5617_v38 = vpop.f32.mrb[2].mxu1  ;;  %v4440_v39 = vadd.f32 %v7166_v26, %v4417_v37 }
 0x43d   :  { %v4325_v27 = vpop.f32.mrb[3].mxu1  ;;  %v4457_v44 = vmax.f32 %v4441_v40, 0.0  ;;  %v4420_v45 = vmul.f32 %v5617_v38, %v7161_v21 }
 0x43e   :  { %v4419_v28 = vmul.f32 %v7161_v21, %v4325_v27  ;;  %v4456_v41 = vmax.f32 %v4440_v39, 0.0 }
 0x43f   :  { %v4443_v50 = vadd.f32 %v7166_v26, %v4420_v45 }
 0x440   :  { %4472 = vxpose.xlu0.b32.start [1/8] (short) (narrow) %v4456_v41, 8  ;;  %v5620_v42 = vpop.f32.mrb[4].mxu1  ;;  %v4442_v46 = vadd.f32 %v7166_v26, %v4419_v28 }
 0x441   :  { %v4335_v43 = vpop.f32.mrb[5].mxu1  ;;  %v4422_v53 = vmul.f32 %v5620_v42, %v7161_v21  ;;  %v4459_v56 = vmax.f32 %v4443_v50, 0.0 }
 0x442   :  { %v4421_v48 = vmul.f32 %v7161_v21, %v4335_v43  ;;  %v4458_v51 = vmax.f32 %v4442_v46, 0.0 }
 0x443   :  { %v4445_v0 = vadd.f32 %v7166_v26, %v4422_v53 }
 0x444   :  { %4473 = vxpose.xlu0.b32.cont [2/8] (short) (narrow) %v4457_v44, 8  ;;  %v5623_v47 = vpop.f32.mrb[6].mxu1  ;;  %v4444_v54 = vadd.f32 %v7166_v26, %v4421_v48 }
 0x445   :  { %v4345_v49 = vpop.f32.mrb[7].mxu1  ;;  %v4461_v16 = vmax.f32 %v4445_v0, 0.0  ;;  %v4424_v17 = vmul.f32 %v5623_v47, %v7161_v21 }
 0x446   :  { %v4460_v1 = vmax.f32 %v4444_v54, 0.0  ;;  %v4423_v4 = vmul.f32 %v7161_v21, %v4345_v49 }
 0x447   :  { %v4447_v7 = vadd.f32 %v7166_v26, %v4424_v17 }
 0x448   :  { %4474 = vxpose.xlu0.b32.cont [3/8] (short) (narrow) %v4458_v51, 8  ;;  %v5626_v52 = vpop.f32.mrb[8].mxu1  ;;  %v4446_v18 = vadd.f32 %v7166_v26, %v4423_v4 }
 0x449   :  { %v4355_v55 = vpop.f32.mrb[9].mxu1  ;;  %v4426_v58 = vmul.f32 %v5626_v52, %v7161_v21  ;;  %v4463_v19 = vmax.f32 %v4447_v7, 0.0 }
 0x44a   :  { %v4425_v59 = vmul.f32 %v7161_v21, %v4355_v55  ;;  %v4462_v9 = vmax.f32 %v4446_v18, 0.0 }
 0x44b   :  { %v4449_v6 = vadd.f32 %v7166_v26, %v4426_v58 }
 0x44c   :  { %4475 = vxpose.xlu0.b32.cont [4/8] (short) (narrow) %v4459_v56, 8  ;;  %v5629_v60 = vpop.f32.mrb[10].mxu1  ;;  %v4448_v62 = vadd.f32 %v7166_v26, %v4425_v59 }
 0x44d   :  { %v4365_v2 = vpop.f32.mrb[11].mxu1  ;;  %v4465_v20 = vmax.f32 %v4449_v6, 0.0  ;;  %v4428_v22 = vmul.f32 %v5629_v60, %v7161_v21 }
 0x44e   :  { %v4427_v10 = vmul.f32 %v7161_v21, %v4365_v2  ;;  %v4464_v11 = vmax.f32 %v4448_v62, 0.0 }
 0x44f   :  { %v4451_v13 = vadd.f32 %v7166_v26, %v4428_v22 }
 0x450   :  { %4476 = vxpose.xlu0.b32.cont [5/8] (short) (narrow) %v4460_v1, 8  ;;  %4506 = vxpose.xlu1.b32.start [1/8] (short) (narrow) %v4464_v11, 8  ;;  %v5632_v14 = vpop.f32.mrb[12].mxu1  ;;  %v4450_v23 = vadd.f32 %v7166_v26, %v4427_v10 }
 0x451   :  { %v4375_v63 = vpop.f32.mrb[13].mxu1  ;;  %v4467_v3 = vmax.f32 %v4451_v13, 0.0  ;;  %v4430_v29 = vmul.f32 %v5632_v14, %v7161_v21 }
 0x452   :  { %v4466_v15 = vmax.f32 %v4450_v23, 0.0  ;;  %v4429_v57 = vmul.f32 %v7161_v21, %v4375_v63 }
 0x453   :  { %v4453_v31 = vadd.f32 %v7166_v26, %v4430_v29 }
 0x454   :  { %4477 = vxpose.xlu0.b32.cont [6/8] (short) (narrow) %v4461_v16, 8  ;;  %4507 = vxpose.xlu1.b32.cont [2/8] (short) (narrow) %v4465_v20, 8  ;;  %v5635_v25 = vpop.f32.mrb[14].mxu1  ;;  %v4452_v30 = vadd.f32 %v7166_v26, %v4429_v57 }
 0x455   :  { %v4385_v5 = vpop.f32.mrb[15].mxu1  ;;  %v4469_v34 = vmax.f32 %v4453_v31, 0.0  ;;  %v4432_v61 = vmul.f32 %v5635_v25, %v7161_v21 }
 0x456   :  { %v4468_v32 = vmax.f32 %v4452_v30, 0.0  ;;  %v4431_v33 = vmul.f32 %v7161_v21, %v4385_v5 }
 0x457   :  { %v4455_v12 = vadd.f32 %v7166_v26, %v4432_v61 }
 0x458   :  { %4478 = vxpose.xlu0.b32.cont [7/8] (short) (narrow) %v4462_v9, 8  ;;  %4508 = vxpose.xlu1.b32.cont [3/8] (short) (narrow) %v4466_v15, 8  ;;  %v4454_v8 = vadd.f32 %v7166_v26, %v4431_v33 }
 0x459   :  { %v4471_v35 = vmax.f32 %v4455_v12, 0.0 }
 0x45a   :  { %v4470_v24 = vmax.f32 %v4454_v8, 0.0 }
 0x45c   :  { %4479 = vxpose.xlu0.b32.end [8/8] (short) (narrow) %v4463_v19, 8  ;;  %4509 = vxpose.xlu1.b32.cont [4/8] (short) (narrow) %v4467_v3, 8 }
 0x460   :  { %4510 = vxpose.xlu1.b32.cont [5/8] (short) (narrow) %v4468_v32, 8 }
 0x464   :  { %4511 = vxpose.xlu1.b32.cont [6/8] (short) (narrow) %v4469_v34, 8 }
 0x468   :  { %4512 = vxpose.xlu1.b32.cont [7/8] (short) (narrow) %v4470_v24, 8 }
 0x46c   :  { %4513 = vxpose.xlu1.b32.end [8/8] (short) (narrow) %v4471_v35, 8 }
 0x4c0   :  { %v4488_v36 = vpop.trf.xlu0 }
 0x4c1   :  { %4505 = vst.msk [vmem:[%s7213_s7] sm:$0xff] %vm4504_vm7, %v4488_v36 }
 0x4d0   :  { %v4522_v37 = vpop.trf.xlu1 }
 0x4d1   :  { %4861 = vst.msk [vmem:[%s7213_s7 + $0x8] sm:$0xff] %vm4504_vm7, %v4522_v37 }

</bundles_post_ra>
